<compile_context>
chip_gen: v5e
topology: v5e:2x2
jax: 0.10.0
libtpu: 0.0.40
codegen_flags: <defaults>
</compile_context>

<pallas_src>
import jax
import jax.numpy as jnp
from jax.experimental import pallas as pl
from jax.experimental.pallas import tpu as pltpu

LANE = 128  # TPU lane width; channel dims and the node dim are padded to this


# ----------------------------- fused Pallas kernel ---------------------------

def make_gin_fused_kernel(num_layers):
    """Entire GIN forward in one kernel body; everything stays in VMEM."""

    def kernel(adj_ref, x_ref, pool_ref,
               w1s_ref, b1s_ref, w2s_ref, b2s_ref,
               hw1_ref, hb1_ref, hw2_ref, hb2_ref,
               out_ref, hcat_ref):
        adj = adj_ref[...]          # (Np, Np) bf16, already A + I (eps = 0)
        h = x_ref[...]              # (Np, LANE) bf16, lane-padded node features

        for l in range(num_layers):           # static unroll (num_layers small)
            # GINConv aggregation: (1+eps)*x_i + sum_j x_j == (A + I) @ x
            agg = jnp.dot(adj, h, preferred_element_type=jnp.float32)
            # Linear (+ folded eval-BatchNorm) -> ReLU
            t = jnp.dot(agg.astype(jnp.bfloat16), w1s_ref[l],
                        preferred_element_type=jnp.float32) + b1s_ref[l]
            t = jnp.maximum(t, 0.0).astype(jnp.bfloat16)
            # Linear (+ folded eval-BatchNorm) -> ReLU
            u = jnp.dot(t, w2s_ref[l],
                        preferred_element_type=jnp.float32) + b2s_ref[l]
            h = jnp.maximum(u, 0.0).astype(jnp.bfloat16)
            # Lane-concat this layer's output into the scratch (no matmul).
            hcat_ref[:, l * LANE:(l + 1) * LANE] = h

        # global_mean_pool(concat([h1..hL])) : one (G, Np) @ (Np, L*LANE) matmul.
        pooled = jnp.dot(pool_ref[...], hcat_ref[...],
                         preferred_element_type=jnp.float32)
        # lin1 over the concatenation: one (G, L*LANE) @ (L*LANE, LANE) matmul.
        hd = jnp.dot(pooled.astype(jnp.bfloat16), hw1_ref[...],
                     preferred_element_type=jnp.float32) + hb1_ref[...]
        # ReLU -> (dropout p=0.5 is identity in eval) -> lin2
        hd = jnp.maximum(hd, 0.0).astype(jnp.bfloat16)
        out_ref[...] = jnp.dot(hd, hw2_ref[...],
                               preferred_element_type=jnp.float32) + hb2_ref[...]

    return kernel


# ------------------------------ JAX wrapper ----------------------------------

def gin_forward(adj_pad, x_pad, pool_pad, packed, num_classes):
    num_layers = packed["w1s"].shape[0]
    num_graphs = pool_pad.shape[0]
    n_pad = adj_pad.shape[0]
    c_pad = packed["hw2"].shape[1]

    inputs = [adj_pad, x_pad, pool_pad,
              packed["w1s"], packed["b1s"], packed["w2s"], packed["b2s"],
              packed["hw1"], packed["hb1"], packed["hw2"], packed["hb2"]]

    in_bytes = sum(int(a.size) * a.dtype.itemsize for a in inputs)
    out_bytes = num_graphs * c_pad * 4
    flops = num_layers * (2 * n_pad * n_pad * LANE           # (A+I) @ h
                          + 2 * 2 * n_pad * LANE * LANE)      # MLP linears
    flops += (2 * num_graphs * n_pad * num_layers * LANE      # pooling (fused)
              + 2 * num_graphs * num_layers * LANE * LANE     # lin1 (fused)
              + 2 * num_graphs * LANE * c_pad)                # lin2

    out = pl.pallas_call(
        make_gin_fused_kernel(num_layers),
        out_shape=jax.ShapeDtypeStruct((num_graphs, c_pad), jnp.float32),
        in_specs=[pl.BlockSpec(memory_space=pltpu.MemorySpace.VMEM)] * len(inputs),
        out_specs=pl.BlockSpec(memory_space=pltpu.MemorySpace.VMEM),
        scratch_shapes=[pltpu.VMEM((n_pad, num_layers * LANE), jnp.bfloat16)],
        compiler_params=pltpu.CompilerParams(vmem_limit_bytes=4 * 1024 * 1024),
        cost_estimate=pl.CostEstimate(flops=flops, transcendentals=0,
                                      bytes_accessed=in_bytes + out_bytes),
    )(*inputs)
    # Strip class-dim padding on the host.
    return out[:, :num_classes]


# --------------------------- parameter construction --------------------------

def _pad2d(a, rows, cols):
    return jnp.pad(a, ((0, rows - a.shape[0]), (0, cols - a.shape[1])))


def make_linear(key, fan_in, fan_out):
    kw, kb = jax.random.split(key)
    # PyTorch Linear stores W as (out, in); we keep the (in, out) transpose.
    w = jax.random.normal(kw, (fan_out, fan_in), jnp.float32) * (1.0 / jnp.sqrt(fan_in))
    b = jax.random.normal(kb, (fan_out,), jnp.float32) * 0.1
    return w.T, b.reshape(1, fan_out)


def make_bn(key, num_feat, eps=1e-5):
    kg, kb, km, kv = jax.random.split(key, 4)
    gamma = 1.0 + 0.1 * jax.random.normal(kg, (num_feat,), jnp.float32)
    beta = 0.1 * jax.random.normal(kb, (num_feat,), jnp.float32)
    running_mean = 0.1 * jax.random.normal(km, (num_feat,), jnp.float32)
    running_var = 1.0 + 0.1 * jax.random.uniform(kv, (num_feat,), jnp.float32)
    scale = gamma / jnp.sqrt(running_var + eps)
    shift = beta - running_mean * scale
    return scale.reshape(1, num_feat), shift.reshape(1, num_feat)


def make_conv_raw(key, fan_in, hidden):
    k1, k2, k3, k4 = jax.random.split(key, 4)
    w1, b1 = make_linear(k1, fan_in, hidden)
    s1, t1 = make_bn(k2, hidden)
    w2, b2 = make_linear(k3, hidden, hidden)
    s2, t2 = make_bn(k4, hidden)
    return dict(w1=w1, b1=b1, s1=s1, t1=t1, w2=w2, b2=b2, s2=s2, t2=t2)


def fold_bn(w, b, scale, shift):
    # Linear followed by eval-mode BatchNorm1d == Linear with rescaled params.
    return w * scale, b * scale + shift


def fold_conv(raw):
    fw1, fb1 = fold_bn(raw["w1"], raw["b1"], raw["s1"], raw["t1"])
    fw2, fb2 = fold_bn(raw["w2"], raw["b2"], raw["s2"], raw["t2"])
    return dict(w1=fw1, b1=fb1, w2=fw2, b2=fb2)


def pack_params(conv_folded, hw1, hb1, hw2, hb2, num_layers, hidden):
    """Stack per-layer params into a handful of lane-padded arrays (few DMAs)."""
    w1s = jnp.stack([_pad2d(p["w1"], LANE, LANE) for p in conv_folded]).astype(jnp.bfloat16)
    b1s = jnp.stack([_pad2d(p["b1"], 1, LANE) for p in conv_folded])   # (L,1,128) f32
    w2s = jnp.stack([_pad2d(p["w2"], LANE, LANE) for p in conv_folded]).astype(jnp.bfloat16)
    b2s = jnp.stack([_pad2d(p["b2"], 1, LANE) for p in conv_folded])   # (L,1,128) f32
    # lin1 weight (L*hidden, hidden) -> one (L*128, 128) slab whose row blocks
    # line up with the lane-concat layout of the kernel scratch; zero padding
    # between blocks contributes nothing.
    hw1_blocks = [_pad2d(hw1[l * hidden:(l + 1) * hidden, :], LANE, LANE)
                  for l in range(num_layers)]
    hw1_full = jnp.concatenate(hw1_blocks, axis=0).astype(jnp.bfloat16)
    return dict(w1s=w1s, b1s=b1s, w2s=w2s, b2s=b2s,
                hw1=hw1_full,
                hb1=_pad2d(hb1, 1, LANE),
                hw2=_pad2d(hw2, LANE, LANE).astype(jnp.bfloat16),
                hb2=_pad2d(hb2, 1, LANE))


# ------------------------------ references -----------------------------------

def reference_f32(x, adj_hat, pool_mat, conv_raw, head_raw):
    # Original (unfolded BN, unpadded, f32) forward semantics.
    xs, h = [], x
    for p in conv_raw:
        agg = adj_hat @ h
        a = jnp.maximum((agg @ p["w1"] + p["b1"]) * p["s1"] + p["t1"], 0.0)
        h = jnp.maximum((a @ p["w2"] + p["b2"]) * p["s2"] + p["t2"], 0.0)
        xs.append(h)
    xcat = jnp.concatenate(xs, axis=1)
    pooled = pool_mat @ xcat
    hd = jnp.maximum(pooled @ head_raw["hw1"] + head_raw["hb1"], 0.0)
    return hd @ head_raw["hw2"] + head_raw["hb2"]


def reference_bf16(x, adj_hat, pool_mat, conv_folded, head_raw):
    # Same BN-folded params and bf16 matmul-input quantization points the kernel uses.
    bf, f32 = jnp.bfloat16, jnp.float32
    adj = adj_hat.astype(bf)
    h = x.astype(bf)
    xs = []
    for p in conv_folded:
        agg = jnp.dot(adj, h, preferred_element_type=f32)
        a = jnp.maximum(jnp.dot(agg.astype(bf), p["w1"].astype(bf),
                                preferred_element_type=f32) + p["b1"], 0.0).astype(bf)
        h = jnp.maximum(jnp.dot(a, p["w2"].astype(bf),
                                preferred_element_type=f32) + p["b2"], 0.0).astype(bf)
        xs.append(h)
    xcat = jnp.concatenate(xs, axis=1)
    pooled = jnp.dot(pool_mat.astype(bf), xcat, preferred_element_type=f32)
    hd = jnp.maximum(jnp.dot(pooled.astype(bf), head_raw["hw1"].astype(bf),
                             preferred_element_type=f32) + head_raw["hb1"], 0.0).astype(bf)
    return jnp.dot(hd, head_raw["hw2"].astype(bf),
                   preferred_element_type=f32) + head_raw["hb2"]


# ----------------------------------- main -------------------------------------

if __name__ == "__main__":
    key = jax.random.PRNGKey(0)

    num_nodes = 64
    num_features = 16
    hidden = 32
    num_layers = 3
    num_classes = 8
    num_graphs = 2
    num_edges = 256

    k_x, k_e, *k_params = jax.random.split(key, 3 + num_layers + 1)

    # Node features.
    x = jax.random.normal(k_x, (num_nodes, num_features), jnp.float32)

    # Random edge_index (2, E); sum aggregation adj[dst, src] += 1 (GINConv).
    src = jax.random.randint(k_e, (num_edges,), 0, num_nodes)
    dst = jax.random.randint(jax.random.fold_in(k_e, 1), (num_edges,), 0, num_nodes)
    adj = jnp.zeros((num_nodes, num_nodes), jnp.float32).at[dst, src].add(1.0)
    adj_hat = adj + jnp.eye(num_nodes, dtype=jnp.float32)  # (1+eps)*x_i + sum_j x_j, eps=0

    # Graph assignment ("batch") and mean-pool matrix (G, N).
    batch = jnp.concatenate([
        jnp.zeros(num_nodes // 2, jnp.int32),
        jnp.ones(num_nodes - num_nodes // 2, jnp.int32),
    ])
    onehot = (batch[None, :] == jnp.arange(num_graphs)[:, None]).astype(jnp.float32)
    counts = jnp.maximum(onehot.sum(axis=1, keepdims=True), 1.0)
    pool_mat = onehot / counts

    # GINConv MLP parameters (conv1: features -> hidden, rest: hidden -> hidden).
    conv_raw = [make_conv_raw(k_params[0], num_features, hidden)]
    for i in range(num_layers - 1):
        conv_raw.append(make_conv_raw(k_params[1 + i], hidden, hidden))
    conv_folded = [fold_conv(p) for p in conv_raw]

    # Head: lin1 (num_layers*hidden -> hidden), lin2 (hidden -> num_classes).
    kh1, kh2 = jax.random.split(k_params[num_layers])
    hw1, hb1 = make_linear(kh1, num_layers * hidden, hidden)
    hw2, hb2 = make_linear(kh2, hidden, num_classes)
    head_raw = dict(hw1=hw1, hb1=hb1, hw2=hw2, hb2=hb2)

    packed = pack_params(conv_folded, hw1, hb1, hw2, hb2, num_layers, hidden)

    # Pad the node dim to a multiple of 128 so adj@h / pool contractions use the
    # full MXU lane width; padded rows/cols of adj & pool are zero, so padded-row
    # garbage in h never reaches the output.
    n_pad = ((num_nodes + LANE - 1) // LANE) * LANE
    adj_pad = jnp.pad(adj_hat, ((0, n_pad - num_nodes), (0, n_pad - num_nodes))
                      ).astype(jnp.bfloat16)   # small integer counts: exact in bf16
    x_pad = _pad2d(x, n_pad, LANE).astype(jnp.bfloat16)
    pool_pad = jnp.pad(pool_mat, ((0, 0), (0, n_pad - num_nodes))
                       ).astype(jnp.bfloat16)  # entries 1/32: exact in bf16

    out = gin_forward(adj_pad, x_pad, pool_pad, packed, num_classes)
    out = jax.block_until_ready(out)
    assert out.shape == (num_graphs, num_classes)

    # Tight check vs a reference using the same bf16 quantization points.
    ref_q = reference_bf16(x, adj_hat, pool_mat, conv_folded, head_raw)
    assert jnp.allclose(out, ref_q, atol=1e-2, rtol=1e-2), "mismatch vs bf16 reference"

    # Loose check vs the original f32 semantics (bf16-level tolerance).
    ref_f = reference_f32(x, adj_hat, pool_mat, conv_raw, head_raw)
    err = float(jnp.max(jnp.abs(out - ref_f)))
    scale = float(jnp.max(jnp.abs(ref_f)))
    assert err <= 0.1 * scale + 0.1, f"mismatch vs f32 reference (err={err}, scale={scale})"

    print("KERNEL_OK")
</pallas_src>

<mosaic_0001>
module attributes {stable_mosaic.version = 11 : i64} {
  func.func @kernel(%arg0: memref<128x128xbf16, #tpu.memory_space<vmem>>, %arg1: memref<128x128xbf16, #tpu.memory_space<vmem>>, %arg2: memref<2x128xbf16, #tpu.memory_space<vmem>>, %arg3: memref<3x128x128xbf16, #tpu.memory_space<vmem>>, %arg4: memref<3x1x128xf32, #tpu.memory_space<vmem>>, %arg5: memref<3x128x128xbf16, #tpu.memory_space<vmem>>, %arg6: memref<3x1x128xf32, #tpu.memory_space<vmem>>, %arg7: memref<384x128xbf16, #tpu.memory_space<vmem>>, %arg8: memref<1x128xf32, #tpu.memory_space<vmem>>, %arg9: memref<128x128xbf16, #tpu.memory_space<vmem>>, %arg10: memref<1x128xf32, #tpu.memory_space<vmem>>, %arg11: memref<2x128xf32, #tpu.memory_space<vmem>>, %arg12: memref<128x384xbf16, #tpu.memory_space<vmem>>) attributes {dimension_semantics = [], scalar_prefetch = 0 : i64, scratch_operands = 1 : i64, tpu.core_type = #tpu.core_type<tc>} {
    %c0 = arith.constant 0 : index
    %c0_0 = arith.constant 0 : index
    %0 = vector.load %arg0[%c0, %c0_0] : memref<128x128xbf16, #tpu.memory_space<vmem>>, vector<128x128xbf16>
    %c0_1 = arith.constant 0 : index
    %c0_2 = arith.constant 0 : index
    %1 = vector.load %arg1[%c0_1, %c0_2] : memref<128x128xbf16, #tpu.memory_space<vmem>>, vector<128x128xbf16>
    %cst = arith.constant dense<0.000000e+00> : vector<128x128xf32>
    %2 = tpu.matmul %0, %1, %cst {dimension_numbers = #tpu.dot_dimension_numbers<[1], [0], [0], [1], [0, 0, 1, 1], [], []>} : vector<128x128xbf16>, vector<128x128xbf16>, vector<128x128xf32> -> vector<128x128xf32>
    %3 = arith.truncf %2 : vector<128x128xf32> to vector<128x128xbf16>
    %c0_3 = arith.constant 0 : index
    %c0_4 = arith.constant 0 : index
    %c0_5 = arith.constant 0 : index
    %4 = vector.load %arg3[%c0_3, %c0_4, %c0_5] : memref<3x128x128xbf16, #tpu.memory_space<vmem>>, vector<1x128x128xbf16>
    %5 = vector.shape_cast %4 : vector<1x128x128xbf16> to vector<128x128xbf16>
    %cst_6 = arith.constant dense<0.000000e+00> : vector<128x128xf32>
    %6 = tpu.matmul %3, %5, %cst_6 {dimension_numbers = #tpu.dot_dimension_numbers<[1], [0], [0], [1], [0, 0, 1, 1], [], []>} : vector<128x128xbf16>, vector<128x128xbf16>, vector<128x128xf32> -> vector<128x128xf32>
    %c0_7 = arith.constant 0 : index
    %c0_8 = arith.constant 0 : index
    %c0_9 = arith.constant 0 : index
    %7 = vector.load %arg4[%c0_7, %c0_8, %c0_9] : memref<3x1x128xf32, #tpu.memory_space<vmem>>, vector<1x1x128xf32>
    %8 = vector.shape_cast %7 : vector<1x1x128xf32> to vector<1x128xf32>
    %9 = vector.broadcast %8 : vector<1x128xf32> to vector<128x128xf32>
    %10 = arith.addf %6, %9 : vector<128x128xf32>
    %cst_10 = arith.constant 0.000000e+00 : f32
    %11 = vector.broadcast %cst_10 : f32 to vector<128x128xf32>
    %12 = arith.maximumf %10, %11 : vector<128x128xf32>
    %13 = arith.truncf %12 : vector<128x128xf32> to vector<128x128xbf16>
    %c0_11 = arith.constant 0 : index
    %c0_12 = arith.constant 0 : index
    %c0_13 = arith.constant 0 : index
    %14 = vector.load %arg5[%c0_11, %c0_12, %c0_13] : memref<3x128x128xbf16, #tpu.memory_space<vmem>>, vector<1x128x128xbf16>
    %15 = vector.shape_cast %14 : vector<1x128x128xbf16> to vector<128x128xbf16>
    %cst_14 = arith.constant dense<0.000000e+00> : vector<128x128xf32>
    %16 = tpu.matmul %13, %15, %cst_14 {dimension_numbers = #tpu.dot_dimension_numbers<[1], [0], [0], [1], [0, 0, 1, 1], [], []>} : vector<128x128xbf16>, vector<128x128xbf16>, vector<128x128xf32> -> vector<128x128xf32>
    %c0_15 = arith.constant 0 : index
    %c0_16 = arith.constant 0 : index
    %c0_17 = arith.constant 0 : index
    %17 = vector.load %arg6[%c0_15, %c0_16, %c0_17] : memref<3x1x128xf32, #tpu.memory_space<vmem>>, vector<1x1x128xf32>
    %18 = vector.shape_cast %17 : vector<1x1x128xf32> to vector<1x128xf32>
    %19 = vector.broadcast %18 : vector<1x128xf32> to vector<128x128xf32>
    %20 = arith.addf %16, %19 : vector<128x128xf32>
    %cst_18 = arith.constant 0.000000e+00 : f32
    %21 = vector.broadcast %cst_18 : f32 to vector<128x128xf32>
    %22 = arith.maximumf %20, %21 : vector<128x128xf32>
    %23 = arith.truncf %22 : vector<128x128xf32> to vector<128x128xbf16>
    %c0_19 = arith.constant 0 : index
    %c0_20 = arith.constant 0 : index
    %24 = vector.load %arg12[%c0_19, %c0_20] : memref<128x384xbf16, #tpu.memory_space<vmem>>, vector<128x128xbf16>
    tpu.vector_store %arg12[%c0_19, %c0_20], %23 {strides = array<i32>} : memref<128x384xbf16, #tpu.memory_space<vmem>>, vector<128x128xbf16>,
    %cst_21 = arith.constant dense<0.000000e+00> : vector<128x128xf32>
    %25 = tpu.matmul %0, %23, %cst_21 {dimension_numbers = #tpu.dot_dimension_numbers<[1], [0], [0], [1], [0, 0, 1, 1], [], []>} : vector<128x128xbf16>, vector<128x128xbf16>, vector<128x128xf32> -> vector<128x128xf32>
    %26 = arith.truncf %25 : vector<128x128xf32> to vector<128x128xbf16>
    %c1 = arith.constant 1 : index
    %c0_22 = arith.constant 0 : index
    %c0_23 = arith.constant 0 : index
    %27 = vector.load %arg3[%c1, %c0_22, %c0_23] : memref<3x128x128xbf16, #tpu.memory_space<vmem>>, vector<1x128x128xbf16>
    %28 = vector.shape_cast %27 : vector<1x128x128xbf16> to vector<128x128xbf16>
    %cst_24 = arith.constant dense<0.000000e+00> : vector<128x128xf32>
    %29 = tpu.matmul %26, %28, %cst_24 {dimension_numbers = #tpu.dot_dimension_numbers<[1], [0], [0], [1], [0, 0, 1, 1], [], []>} : vector<128x128xbf16>, vector<128x128xbf16>, vector<128x128xf32> -> vector<128x128xf32>
    %c1_25 = arith.constant 1 : index
    %c0_26 = arith.constant 0 : index
    %c0_27 = arith.constant 0 : index
    %30 = vector.load %arg4[%c1_25, %c0_26, %c0_27] : memref<3x1x128xf32, #tpu.memory_space<vmem>>, vector<1x1x128xf32>
    %31 = vector.shape_cast %30 : vector<1x1x128xf32> to vector<1x128xf32>
    %32 = vector.broadcast %31 : vector<1x128xf32> to vector<128x128xf32>
    %33 = arith.addf %29, %32 : vector<128x128xf32>
    %cst_28 = arith.constant 0.000000e+00 : f32
    %34 = vector.broadcast %cst_28 : f32 to vector<128x128xf32>
    %35 = arith.maximumf %33, %34 : vector<128x128xf32>
    %36 = arith.truncf %35 : vector<128x128xf32> to vector<128x128xbf16>
    %c1_29 = arith.constant 1 : index
    %c0_30 = arith.constant 0 : index
    %c0_31 = arith.constant 0 : index
    %37 = vector.load %arg5[%c1_29, %c0_30, %c0_31] : memref<3x128x128xbf16, #tpu.memory_space<vmem>>, vector<1x128x128xbf16>
    %38 = vector.shape_cast %37 : vector<1x128x128xbf16> to vector<128x128xbf16>
    %cst_32 = arith.constant dense<0.000000e+00> : vector<128x128xf32>
    %39 = tpu.matmul %36, %38, %cst_32 {dimension_numbers = #tpu.dot_dimension_numbers<[1], [0], [0], [1], [0, 0, 1, 1], [], []>} : vector<128x128xbf16>, vector<128x128xbf16>, vector<128x128xf32> -> vector<128x128xf32>
    %c1_33 = arith.constant 1 : index
    %c0_34 = arith.constant 0 : index
    %c0_35 = arith.constant 0 : index
    %40 = vector.load %arg6[%c1_33, %c0_34, %c0_35] : memref<3x1x128xf32, #tpu.memory_space<vmem>>, vector<1x1x128xf32>
    %41 = vector.shape_cast %40 : vector<1x1x128xf32> to vector<1x128xf32>
    %42 = vector.broadcast %41 : vector<1x128xf32> to vector<128x128xf32>
    %43 = arith.addf %39, %42 : vector<128x128xf32>
    %cst_36 = arith.constant 0.000000e+00 : f32
    %44 = vector.broadcast %cst_36 : f32 to vector<128x128xf32>
    %45 = arith.maximumf %43, %44 : vector<128x128xf32>
    %46 = arith.truncf %45 : vector<128x128xf32> to vector<128x128xbf16>
    %c0_37 = arith.constant 0 : index
    %c128 = arith.constant 128 : index
    %47 = vector.load %arg12[%c0_37, %c128] : memref<128x384xbf16, #tpu.memory_space<vmem>>, vector<128x128xbf16>
    tpu.vector_store %arg12[%c0_37, %c128], %46 {strides = array<i32>} : memref<128x384xbf16, #tpu.memory_space<vmem>>, vector<128x128xbf16>,
    %cst_38 = arith.constant dense<0.000000e+00> : vector<128x128xf32>
    %48 = tpu.matmul %0, %46, %cst_38 {dimension_numbers = #tpu.dot_dimension_numbers<[1], [0], [0], [1], [0, 0, 1, 1], [], []>} : vector<128x128xbf16>, vector<128x128xbf16>, vector<128x128xf32> -> vector<128x128xf32>
    %49 = arith.truncf %48 : vector<128x128xf32> to vector<128x128xbf16>
    %c2 = arith.constant 2 : index
    %c0_39 = arith.constant 0 : index
    %c0_40 = arith.constant 0 : index
    %50 = vector.load %arg3[%c2, %c0_39, %c0_40] : memref<3x128x128xbf16, #tpu.memory_space<vmem>>, vector<1x128x128xbf16>
    %51 = vector.shape_cast %50 : vector<1x128x128xbf16> to vector<128x128xbf16>
    %cst_41 = arith.constant dense<0.000000e+00> : vector<128x128xf32>
    %52 = tpu.matmul %49, %51, %cst_41 {dimension_numbers = #tpu.dot_dimension_numbers<[1], [0], [0], [1], [0, 0, 1, 1], [], []>} : vector<128x128xbf16>, vector<128x128xbf16>, vector<128x128xf32> -> vector<128x128xf32>
    %c2_42 = arith.constant 2 : index
    %c0_43 = arith.constant 0 : index
    %c0_44 = arith.constant 0 : index
    %53 = vector.load %arg4[%c2_42, %c0_43, %c0_44] : memref<3x1x128xf32, #tpu.memory_space<vmem>>, vector<1x1x128xf32>
    %54 = vector.shape_cast %53 : vector<1x1x128xf32> to vector<1x128xf32>
    %55 = vector.broadcast %54 : vector<1x128xf32> to vector<128x128xf32>
    %56 = arith.addf %52, %55 : vector<128x128xf32>
    %cst_45 = arith.constant 0.000000e+00 : f32
    %57 = vector.broadcast %cst_45 : f32 to vector<128x128xf32>
    %58 = arith.maximumf %56, %57 : vector<128x128xf32>
    %59 = arith.truncf %58 : vector<128x128xf32> to vector<128x128xbf16>
    %c2_46 = arith.constant 2 : index
    %c0_47 = arith.constant 0 : index
    %c0_48 = arith.constant 0 : index
    %60 = vector.load %arg5[%c2_46, %c0_47, %c0_48] : memref<3x128x128xbf16, #tpu.memory_space<vmem>>, vector<1x128x128xbf16>
    %61 = vector.shape_cast %60 : vector<1x128x128xbf16> to vector<128x128xbf16>
    %cst_49 = arith.constant dense<0.000000e+00> : vector<128x128xf32>
    %62 = tpu.matmul %59, %61, %cst_49 {dimension_numbers = #tpu.dot_dimension_numbers<[1], [0], [0], [1], [0, 0, 1, 1], [], []>} : vector<128x128xbf16>, vector<128x128xbf16>, vector<128x128xf32> -> vector<128x128xf32>
    %c2_50 = arith.constant 2 : index
    %c0_51 = arith.constant 0 : index
    %c0_52 = arith.constant 0 : index
    %63 = vector.load %arg6[%c2_50, %c0_51, %c0_52] : memref<3x1x128xf32, #tpu.memory_space<vmem>>, vector<1x1x128xf32>
    %64 = vector.shape_cast %63 : vector<1x1x128xf32> to vector<1x128xf32>
    %65 = vector.broadcast %64 : vector<1x128xf32> to vector<128x128xf32>
    %66 = arith.addf %62, %65 : vector<128x128xf32>
    %cst_53 = arith.constant 0.000000e+00 : f32
    %67 = vector.broadcast %cst_53 : f32 to vector<128x128xf32>
    %68 = arith.maximumf %66, %67 : vector<128x128xf32>
    %69 = arith.truncf %68 : vector<128x128xf32> to vector<128x128xbf16>
    %c0_54 = arith.constant 0 : index
    %c256 = arith.constant 256 : index
    %70 = vector.load %arg12[%c0_54, %c256] : memref<128x384xbf16, #tpu.memory_space<vmem>>, vector<128x128xbf16>
    tpu.vector_store %arg12[%c0_54, %c256], %69 {strides = array<i32>} : memref<128x384xbf16, #tpu.memory_space<vmem>>, vector<128x128xbf16>,
    %c0_55 = arith.constant 0 : index
    %c0_56 = arith.constant 0 : index
    %71 = vector.load %arg2[%c0_55, %c0_56] : memref<2x128xbf16, #tpu.memory_space<vmem>>, vector<2x128xbf16>
    %c0_57 = arith.constant 0 : index
    %c0_58 = arith.constant 0 : index
    %72 = vector.load %arg12[%c0_57, %c0_58] : memref<128x384xbf16, #tpu.memory_space<vmem>>, vector<128x384xbf16>
    %cst_59 = arith.constant dense<0.000000e+00> : vector<2x384xf32>
    %73 = tpu.matmul %71, %72, %cst_59 {dimension_numbers = #tpu.dot_dimension_numbers<[1], [0], [0], [1], [0, 0, 1, 1], [], []>} : vector<2x128xbf16>, vector<128x384xbf16>, vector<2x384xf32> -> vector<2x384xf32>
    %74 = arith.truncf %73 : vector<2x384xf32> to vector<2x384xbf16>
    %c0_60 = arith.constant 0 : index
    %c0_61 = arith.constant 0 : index
    %75 = vector.load %arg7[%c0_60, %c0_61] : memref<384x128xbf16, #tpu.memory_space<vmem>>, vector<384x128xbf16>
    %cst_62 = arith.constant dense<0.000000e+00> : vector<2x128xf32>
    %76 = tpu.matmul %74, %75, %cst_62 {dimension_numbers = #tpu.dot_dimension_numbers<[1], [0], [0], [1], [0, 0, 1, 1], [], []>} : vector<2x384xbf16>, vector<384x128xbf16>, vector<2x128xf32> -> vector<2x128xf32>
    %c0_63 = arith.constant 0 : index
    %c0_64 = arith.constant 0 : index
    %77 = vector.load %arg8[%c0_63, %c0_64] : memref<1x128xf32, #tpu.memory_space<vmem>>, vector<1x128xf32>
    %78 = vector.broadcast %77 : vector<1x128xf32> to vector<2x128xf32>
    %79 = arith.addf %76, %78 : vector<2x128xf32>
    %cst_65 = arith.constant 0.000000e+00 : f32
    %80 = vector.broadcast %cst_65 : f32 to vector<2x128xf32>
    %81 = arith.maximumf %79, %80 : vector<2x128xf32>
    %82 = arith.truncf %81 : vector<2x128xf32> to vector<2x128xbf16>
    %c0_66 = arith.constant 0 : index
    %c0_67 = arith.constant 0 : index
    %83 = vector.load %arg9[%c0_66, %c0_67] : memref<128x128xbf16, #tpu.memory_space<vmem>>, vector<128x128xbf16>
    %cst_68 = arith.constant dense<0.000000e+00> : vector<2x128xf32>
    %84 = tpu.matmul %82, %83, %cst_68 {dimension_numbers = #tpu.dot_dimension_numbers<[1], [0], [0], [1], [0, 0, 1, 1], [], []>} : vector<2x128xbf16>, vector<128x128xbf16>, vector<2x128xf32> -> vector<2x128xf32>
    %c0_69 = arith.constant 0 : index
    %c0_70 = arith.constant 0 : index
    %85 = vector.load %arg10[%c0_69, %c0_70] : memref<1x128xf32, #tpu.memory_space<vmem>>, vector<1x128xf32>
    %86 = vector.broadcast %85 : vector<1x128xf32> to vector<2x128xf32>
    %87 = arith.addf %84, %86 : vector<2x128xf32>
    %c0_71 = arith.constant 0 : index
    %c0_72 = arith.constant 0 : index
    %88 = vector.load %arg11[%c0_71, %c0_72] : memref<2x128xf32, #tpu.memory_space<vmem>>, vector<2x128xf32>
    tpu.vector_store %arg11[%c0_71, %c0_72], %87 {strides = array<i32>} : memref<2x128xf32, #tpu.memory_space<vmem>>, vector<2x128xf32>,
    return
  }
}

</mosaic_0001>

<bundles_post_ra>
// kernel: tpu_custom_call.1
= control target key start
LH: loop header
LB: loop body
LE: loop exit
PB: predicated region body
PF: predicated region fallthrough
CT: control target
= control target key end

     0   :  { %16 = vsyncpa [#allocation4], 0  ;;  %s3154_s0 = inlined_call_operand.hbm [shape: bf16[128,128], index: 0, kind: input, shape index: {}]   ;;  %s3155_s1 = inlined_call_operand.hbm [shape: bf16[128,128], index: 1, kind: input, shape index: {}]   ;;  %s3156_s2 = inlined_call_operand.hbm [shape: bf16[2,128], index: 2, kind: input, shape index: {}]   ;;  %s3157_s3 = inlined_call_operand.hbm [shape: bf16[3,128,128], index: 3, kind: input, shape index: {}]   ;;  %s3158_s4 = inlined_call_operand.vmem [shape: f32[3,1,128], index: 4, kind: input, shape index: {}]   ;;  %s3159_s5 = inlined_call_operand.hbm [shape: bf16[3,128,128], index: 5, kind: input, shape index: {}]   ;;  %s3160_s6 = inlined_call_operand.hbm [shape: f32[3,1,128], index: 6, kind: input, shape index: {}]   ;;  %s3161_s7 = inlined_call_operand.hbm [shape: bf16[384,128], index: 7, kind: input, shape index: {}]   ;;  %s3162_s8 = inlined_call_operand.vmem [shape: f32[1,128], index: 8, kind: input, shape index: {}]   ;;  %s3163_s9 = inlined_call_operand.hbm [shape: bf16[128,128], index: 9, kind: input, shape index: {}]   ;;  %s3164_s10 = inlined_call_operand.vmem [shape: f32[1,128], index: 10, kind: input, shape index: {}]   ;;  %s3165_s11 = inlined_call_operand.hbm [shape: f32[2,128], index: 11, kind: output, shape index: {}]  }
   0x1   :  { %17 = vsyncpa [#allocation7], 0 }
   0x2   :  { %18 = vsyncpa [#allocation10], 0 }
   0x3   :  { %19 = vsyncpa [#allocation13], 0 }
   0x4   :  { %20 = vsyncpa [#allocation16], 0 }
   0x5   :  { %21 = vsyncpa [#allocation5], 0  ;;  %s39_s19 = sshll.u32 %s3155_s1, 4  ;;  %s2901_s20 = smov [#allocation6]   ;;  %s40_s19 = int_to_ptr.hbm [resolvable:$true] %s39_s19 }
   0x6   :  { %s41_s21 = sshll.u32 %s2901_s20, 4  ;;  %s63_s24 = sshll.u32 %s3157_s3, 4  ;;  %s42_s21 = int_to_ptr.vmem [resolvable:$true] %s41_s21  ;;  %s64_s24 = int_to_ptr.hbm [resolvable:$true] %s63_s24 }
   0x7   :  { %s2902_s25 = smov 64   ;;  %s2903_s26 = smov 4  }
   0x8   :  { %47 = dma.hbm_to_vmem [thread:$0]  %s40_s19, 1024, %s42_s21, [#allocation7], %s2902_s25, %s2902_s25, %s2903_s26  }
   0x9   :  { %s2904_s27 = smov [#allocation9]   ;;  %s91_s1 = sshll.u32 %s3160_s6, 4  ;;  %s92_s1 = int_to_ptr.hbm [resolvable:$true] %s91_s1 }
   0xa   :  { %s65_s28 = sshll.u32 %s2904_s27, 4  ;;  %s2905_s3 = smov [#allocation12]   ;;  %s66_s28 = int_to_ptr.vmem [resolvable:$true] %s65_s28 }
   0xb   :  { %71 = dma.hbm_to_vmem [thread:$0]  %s64_s24, 3072, %s66_s28, [#allocation10], %s2902_s25, %s2902_s25, %s2903_s26  }
   0xc   :  { %s93_s12 = sshll.u32 %s2905_s3, 4  ;;  %s26_s15 = sshll.u32 %s3154_s0, 4  ;;  %s94_s12 = int_to_ptr.vmem [resolvable:$true] %s93_s12  ;;  %s27_s15 = int_to_ptr.hbm [resolvable:$true] %s26_s15 }
   0xd   :  { %s2906_s16 = smov 16   ;;  %s2907_s17 = smov 1  }
   0xe   :  { %99 = dma.hbm_to_vmem [thread:$0]  %s92_s1, 48, %s94_s12, [#allocation13], %s2906_s16, %s2906_s16, %s2907_s17  }
   0xf   :  { %s2908_s18 = smov [#allocation3]   ;;  %s53_s21 = sshll.u32 %s3156_s2, 4  ;;  %s54_s21 = int_to_ptr.hbm [resolvable:$true] %s53_s21 }
  0x10   :  { %s28_s19 = sshll.u32 %s2908_s18, 4  ;;  %s78_s0 = sshll.u32 %s3159_s5, 4  ;;  %s29_s19 = int_to_ptr.vmem [resolvable:$true] %s28_s19  ;;  %s79_s0 = int_to_ptr.hbm [resolvable:$true] %s78_s0 }
  0x11   :  { %34 = dma.hbm_to_vmem [thread:$0]  %s27_s15, 1024, %s29_s19, [#allocation4], %s2902_s25, %s2902_s25, %s2903_s26  }
  0x12   :  { %s2909_s24 = smov [#allocation8]   ;;  %s2910_s28 = smov [#allocation11]  }
  0x13   :  { %s55_s27 = sshll.u32 %s2909_s24, 4  ;;  %s80_s29 = sshll.u32 %s2910_s28, 4  ;;  %s56_s27 = int_to_ptr.vmem [resolvable:$true] %s55_s27  ;;  %s81_s29 = int_to_ptr.vmem [resolvable:$true] %s80_s29 }
  0x14   :  { %58 = dma.hbm_to_vmem [thread:$0]  %s54_s21, 16, %s56_s27, [#allocation7]  }
  0x15   :  { %s104_s2 = sshll.u32 %s3161_s7, 4  ;;  %s119_s5 = sshll.u32 %s3163_s9, 4  ;;  %s105_s2 = int_to_ptr.hbm [resolvable:$true] %s104_s2  ;;  %s120_s5 = int_to_ptr.hbm [resolvable:$true] %s119_s5 }
  0x16   :  { %86 = dma.hbm_to_vmem [thread:$0]  %s79_s0, 3072, %s81_s29, [#allocation10], %s2902_s25, %s2902_s25, %s2903_s26  }
  0x17   :  { %s2911_s13 = smov [#allocation14]   ;;  %s2912_s15 = smov [#allocation15]  }
  0x18   :  { %s106_s14 = sshll.u32 %s2911_s13, 4  ;;  %s121_s7 = sshll.u32 %s2912_s15, 4  ;;  %s107_s14 = int_to_ptr.vmem [resolvable:$true] %s106_s14  ;;  %s122_s7 = int_to_ptr.vmem [resolvable:$true] %s121_s7 }
  0x19   :  { %112 = dma.hbm_to_vmem [thread:$0]  %s105_s2, 3072, %s107_s14, [#allocation13], %s2902_s25, %s2902_s25, %s2903_s26  }
  0x1a   :  { %127 = dma.hbm_to_vmem [thread:$0]  %s120_s5, 1024, %s122_s7, [#allocation16], %s2902_s25, %s2902_s25, %s2903_s26  }
  0x1b   :  { %2889 = dma.done.wait [#allocation4], 1024  }
  0x1c   :  { %2890 = vsyncadd [#allocation4], 4294966272 }
  0x1d   :  { %2891 = dma.done.wait [#allocation7], 1040  }
  0x1e   :  { %2892 = vsyncadd [#allocation7], 4294966256 }
  0x1f   :  { %2893 = dma.done.wait [#allocation10], 6144  }
  0x20   :  { %2894 = vsyncadd [#allocation10], 4294961152 }
  0x21   :  { %2895 = dma.done.wait [#allocation13], 3120  }
  0x22   :  { %2896 = vsyncadd [#allocation13], 4294964176 }
  0x23   :  { %2897 = dma.done.wait [#allocation16], 1024  }
  0x24   :  { %2898 = vsyncadd [#allocation16], 4294966272  ;;  %v2523_v0 = vld [vmem:[#allocation6 + $0x38] sm:$0xff]  ;;  %v2522_v1 = vld [vmem:[#allocation6 + $0x30] sm:$0xff]  ;;  %s2913_s21 = smov [#allocation17]   ;;  %s2012_s24 = sshll.u32 %s3165_s11, 4  ;;  %s2013_s24 = int_to_ptr.hbm [resolvable:$true] %s2012_s24 }
  0x25   :  { %290 = vmatpush.bf16.msra.mxu0 %v2523_v0  ;;  %2628 = vmatpush.bf16.msra.mxu2 %v2523_v0  ;;  %v2521_v2 = vld [vmem:[#allocation6 + $0x28] sm:$0xff]  ;;  %v2520_v3 = vld [vmem:[#allocation6 + $0x20] sm:$0xff]  ;;  %v2519_v4 = vld [vmem:[#allocation6 + $0x18] sm:$0xff]  ;;  %s2010_s22 = sshll.u32 %s2913_s21, 4  ;;  %s2011_s22 = int_to_ptr.vmem [resolvable:$true] %s2010_s22 }
  0x26   :  { %2629 = vmatpush.bf16.msra.mxu3 %v2523_v0  ;;  %v2518_v5 = vld [vmem:[#allocation6 + $0x10] sm:$0xff]  ;;  %v2517_v6 = vld [vmem:[#allocation6 + $0x8] sm:$0xff]  ;;  %v2516_v7 = vld [vmem:[#allocation6] sm:$0xff] }
  0x27   :  { %v3016_v8 = vld [vmem:[#allocation3] sm:$0xff]  ;;  %v3019_v9 = vld [vmem:[#allocation3 + $0x8] sm:$0xff]  ;;  %v3022_v10 = vld [vmem:[#allocation3 + $0x10] sm:$0xff] }
  0x28   :  { %v3025_v11 = vld [vmem:[#allocation3 + $0x28] sm:$0xff]  ;;  %v3027_v12 = vld [vmem:[#allocation3 + $0x38] sm:$0xff]  ;;  %v3033_v18 = vld [vmem:[#allocation3 + $0x30] sm:$0xff] }
  0x29   :  { %291 = vmatpush.bf16.msra.mxu0 %v2522_v1  ;;  %2630 = vmatpush.bf16.msra.mxu2 %v2522_v1  ;;  %v2531_v13 = vld [vmem:[#allocation9 + $0x38] sm:$0xff]  ;;  %v2530_v14 = vld [vmem:[#allocation9 + $0x30] sm:$0xff]  ;;  %v2529_v15 = vld [vmem:[#allocation9 + $0x28] sm:$0xff] }
  0x2a   :  { %2631 = vmatpush.bf16.msra.mxu3 %v2522_v1  ;;  %415 = vmatpush.bf16.msra.mxu1 %v2531_v13  ;;  %v2528_v16 = vld [vmem:[#allocation9 + $0x20] sm:$0xff]  ;;  %v3031_v17 = vld [vmem:[#allocation3 + $0x18] sm:$0xff]  ;;  %v2525_v22 = vld [vmem:[#allocation9 + $0x8] sm:$0xff] }
  0x2b   :  { %v2527_v19 = vld [vmem:[#allocation9 + $0x18] sm:$0xff]  ;;  %v2526_v21 = vld [vmem:[#allocation9 + $0x10] sm:$0xff]  ;;  %v2524_v23 = vld [vmem:[#allocation9] sm:$0xff] }
  0x2c   :  { %v3037_v20 = vld [vmem:[#allocation3 + $0x20] sm:$0xff]  ;;  %v2538_v43 = vld [vmem:[#allocation11 + $0x30] sm:$0xff]  ;;  %v2537_v45 = vld [vmem:[#allocation11 + $0x28] sm:$0xff] }
  0x2d   :  { %292 = vmatpush.bf16.msra.mxu0 %v2521_v2  ;;  %2632 = vmatpush.bf16.msra.mxu2 %v2521_v2  ;;  %v2539_v40 = vld [vmem:[#allocation11 + $0x38] sm:$0xff]  ;;  %v2536_v46 = vld [vmem:[#allocation11 + $0x20] sm:$0xff]  ;;  %v2534_v50 = vld [vmem:[#allocation11 + $0x10] sm:$0xff] }
  0x2e   :  { %2633 = vmatpush.bf16.msra.mxu3 %v2521_v2  ;;  %416 = vmatpush.bf16.msra.mxu1 %v2530_v14  ;;  %v2535_v48 = vld [vmem:[#allocation11 + $0x18] sm:$0xff]  ;;  %v2533_v52 = vld [vmem:[#allocation11 + $0x8] sm:$0xff]  ;;  %v2532_v53 = vld [vmem:[#allocation11] sm:$0xff] }
  0x2f   :  { %v2657_v57 = vld [vmem:[%s3158_s4] ss:$0 sm:$0xff] }
  0x31   :  { %293 = vmatpush.bf16.msra.mxu0 %v2520_v3  ;;  %2634 = vmatpush.bf16.msra.mxu2 %v2520_v3 }
  0x32   :  { %2635 = vmatpush.bf16.msra.mxu3 %v2520_v3  ;;  %417 = vmatpush.bf16.msra.mxu1 %v2529_v15 }
  0x35   :  { %294 = vmatpush.bf16.msra.mxu0 %v2519_v4  ;;  %2636 = vmatpush.bf16.msra.mxu2 %v2519_v4 }
  0x36   :  { %2637 = vmatpush.bf16.msra.mxu3 %v2519_v4  ;;  %418 = vmatpush.bf16.msra.mxu1 %v2528_v16 }
  0x39   :  { %295 = vmatpush.bf16.msra.mxu0 %v2518_v5  ;;  %2638 = vmatpush.bf16.msra.mxu2 %v2518_v5 }
  0x3a   :  { %2639 = vmatpush.bf16.msra.mxu3 %v2518_v5  ;;  %419 = vmatpush.bf16.msra.mxu1 %v2527_v19 }
  0x3d   :  { %296 = vmatpush.bf16.msra.mxu0 %v2517_v6  ;;  %2640 = vmatpush.bf16.msra.mxu2 %v2517_v6 }
  0x3e   :  { %2641 = vmatpush.bf16.msra.mxu3 %v2517_v6  ;;  %420 = vmatpush.bf16.msra.mxu1 %v2526_v21 }
  0x41   :  { %297 = vmatpush.bf16.msra.mxu0 %v2516_v7  ;;  %2642 = vmatpush.bf16.msra.mxu2 %v2516_v7 }
  0x42   :  { %2643 = vmatpush.bf16.msra.mxu3 %v2516_v7  ;;  %421 = vmatpush.bf16.msra.mxu1 %v2525_v22 }
  0x44   :  { %298 = vmatmul.bf16.vlgmr.msra.gmra.mxu0 %v3016_v8  ;;  %323 = vmatmul.bf16.vlgmr.msra.gmra.mxu2 %v3025_v11 }
  0x45   :  { %333 = vmatmul.bf16.vlgmr.msra.gmra.mxu3 %v3027_v12  ;;  %556 = vmatpush.bf16.msrb.mxu2 %v2539_v40 }
  0x46   :  { %422 = vmatpush.bf16.msra.mxu1 %v2524_v23 }
  0x49   :  { %557 = vmatpush.bf16.msrb.mxu2 %v2538_v43 }
  0x4d   :  { %558 = vmatpush.bf16.msrb.mxu2 %v2537_v45 }
  0x51   :  { %559 = vmatpush.bf16.msrb.mxu2 %v2536_v46 }
  0x54   :  { %303 = vmatmul.bf16.gmra.mxu0 %v3019_v9  ;;  %328 = vmatmul.bf16.gmra.mxu2 %v3033_v18 }
  0x55   :  { %560 = vmatpush.bf16.msrb.mxu2 %v2535_v48 }
  0x59   :  { %561 = vmatpush.bf16.msrb.mxu2 %v2534_v50 }
  0x5d   :  { %562 = vmatpush.bf16.msrb.mxu2 %v2533_v52 }
  0x61   :  { %563 = vmatpush.bf16.msrb.mxu2 %v2532_v53 }
  0x64   :  { %308 = vmatmul.bf16.gmra.mxu0 %v3022_v10 }
  0x74   :  { %313 = vmatmul.bf16.gmra.mxu0 %v3031_v17 }
  0x84   :  { %318 = vmatmul.bf16.gmra.mxu0 %v3037_v20 }
  0xc1   :  { %v299_v24 = vpop.f32.mrf.mxu0 }
  0xc7   :  { %v324_v38 = vpop.f32.mrf.mxu2 }
  0xc8   :  { %v334_v51 = vpop.f32.mrf.mxu3 }
  0xc9   :  { %v301_v25 = vpop.f32.mrf.mxu0 }
  0xca   :  { %v339_v26 = vpack.c.bf16 %v301_v25, %v299_v24 }
  0xcc   :  { %423 = vmatmul.bf16.vlgmr.msra.gmra.mxu1 %v339_v26 }
  0xcf   :  { %v326_v41 = vpop.f32.mrf.mxu2 }
  0xd0   :  { %v344_v42 = vpack.c.bf16 %v326_v41, %v324_v38  ;;  %v336_v54 = vpop.f32.mrf.mxu3 }
  0xd1   :  { %v304_v27 = vpop.f32.mrf.mxu0  ;;  %v346_v55 = vpack.c.bf16 %v336_v54, %v334_v51 }
  0xd7   :  { %v329_v44 = vpop.f32.mrf.mxu2 }
  0xd9   :  { %v306_v28 = vpop.f32.mrf.mxu0 }
  0xda   :  { %v340_v29 = vpack.c.bf16 %v306_v28, %v304_v27 }
  0xdc   :  { %428 = vmatmul.bf16.gmra.mxu1 %v340_v29 }
  0xdf   :  { %v331_v47 = vpop.f32.mrf.mxu2 }
  0xe0   :  { %v345_v49 = vpack.c.bf16 %v331_v47, %v329_v44 }
  0xe1   :  { %v309_v30 = vpop.f32.mrf.mxu0 }
  0xe9   :  { %v311_v31 = vpop.f32.mrf.mxu0 }
  0xea   :  { %v341_v32 = vpack.c.bf16 %v311_v31, %v309_v30 }
  0xec   :  { %433 = vmatmul.bf16.gmra.mxu1 %v341_v32 }
  0xf1   :  { %v314_v33 = vpop.f32.mrf.mxu0 }
  0xf9   :  { %v316_v34 = vpop.f32.mrf.mxu0 }
  0xfa   :  { %v342_v35 = vpack.c.bf16 %v316_v34, %v314_v33 }
  0xfc   :  { %438 = vmatmul.bf16.gmra.mxu1 %v342_v35 }
 0x101   :  { %v319_v36 = vpop.f32.mrf.mxu0 }
 0x109   :  { %v321_v37 = vpop.f32.mrf.mxu0 }
 0x10a   :  { %v343_v39 = vpack.c.bf16 %v321_v37, %v319_v36 }
 0x10c   :  { %443 = vmatmul.bf16.gmra.mxu1 %v343_v39 }
 0x11c   :  { %448 = vmatmul.bf16.gmra.mxu1 %v344_v42 }
 0x12c   :  { %453 = vmatmul.bf16.gmra.mxu1 %v345_v49 }
 0x13c   :  { %458 = vmatmul.bf16.gmra.mxu1 %v346_v55 }
 0x149   :  { %v424_v56 = vpop.f32.mrf.mxu1 }
 0x14a   :  { %v425_v58 = vadd.f32 %v2657_v57, %v424_v56 }
 0x14c   :  { %v464_v61 = vmax.f32 %v425_v58, 0.0  ;;  %v3043_v58 = vld [vmem:[#allocation12] ss:$0 sm:$0xff] }
 0x151   :  { %v426_v59 = vpop.f32.mrf.mxu1 }
 0x152   :  { %v427_v60 = vadd.f32 %v2657_v57, %v426_v59 }
 0x154   :  { %v465_v62 = vmax.f32 %v427_v60, 0.0 }
 0x156   :  { %v480_v63 = vpack.c.bf16 %v465_v62, %v464_v61 }
 0x158   :  { %564 = vmatmul.bf16.vlgmr.msrb.gmra.mxu2 %v480_v63 }
 0x159   :  { %v429_v0 = vpop.f32.mrf.mxu1 }
 0x15a   :  { %v430_v1 = vadd.f32 %v2657_v57, %v429_v0 }
 0x15c   :  { %v466_v4 = vmax.f32 %v430_v1, 0.0 }
 0x161   :  { %v431_v2 = vpop.f32.mrf.mxu1 }
 0x162   :  { %v432_v3 = vadd.f32 %v2657_v57, %v431_v2 }
 0x164   :  { %v467_v5 = vmax.f32 %v432_v3, 0.0 }
 0x166   :  { %v481_v6 = vpack.c.bf16 %v467_v5, %v466_v4 }
 0x168   :  { %569 = vmatmul.bf16.gmra.mxu2 %v481_v6 }
 0x169   :  { %v434_v7 = vpop.f32.mrf.mxu1 }
 0x16a   :  { %v435_v13 = vadd.f32 %v2657_v57, %v434_v7 }
 0x16c   :  { %v468_v16 = vmax.f32 %v435_v13, 0.0 }
 0x171   :  { %v436_v14 = vpop.f32.mrf.mxu1 }
 0x172   :  { %v437_v15 = vadd.f32 %v2657_v57, %v436_v14 }
 0x174   :  { %v469_v19 = vmax.f32 %v437_v15, 0.0 }
 0x176   :  { %v482_v21 = vpack.c.bf16 %v469_v19, %v468_v16 }
 0x178   :  { %574 = vmatmul.bf16.gmra.mxu2 %v482_v21 }
 0x179   :  { %v439_v22 = vpop.f32.mrf.mxu1 }
 0x17a   :  { %v440_v23 = vadd.f32 %v2657_v57, %v439_v22 }
 0x17c   :  { %v470_v26 = vmax.f32 %v440_v23, 0.0 }
 0x181   :  { %v441_v24 = vpop.f32.mrf.mxu1 }
 0x182   :  { %v442_v25 = vadd.f32 %v2657_v57, %v441_v24 }
 0x184   :  { %v471_v27 = vmax.f32 %v442_v25, 0.0 }
 0x186   :  { %v483_v28 = vpack.c.bf16 %v471_v27, %v470_v26 }
 0x188   :  { %579 = vmatmul.bf16.gmra.mxu2 %v483_v28 }
 0x189   :  { %v444_v29 = vpop.f32.mrf.mxu1 }
 0x18a   :  { %v445_v30 = vadd.f32 %v2657_v57, %v444_v29 }
 0x18c   :  { %v472_v33 = vmax.f32 %v445_v30, 0.0 }
 0x191   :  { %v446_v31 = vpop.f32.mrf.mxu1 }
 0x192   :  { %v447_v32 = vadd.f32 %v2657_v57, %v446_v31 }
 0x194   :  { %v473_v34 = vmax.f32 %v447_v32, 0.0 }
 0x196   :  { %v484_v35 = vpack.c.bf16 %v473_v34, %v472_v33 }
 0x198   :  { %584 = vmatmul.bf16.gmra.mxu2 %v484_v35 }
 0x199   :  { %v449_v36 = vpop.f32.mrf.mxu1 }
 0x19a   :  { %v450_v37 = vadd.f32 %v2657_v57, %v449_v36 }
 0x19c   :  { %v474_v40 = vmax.f32 %v450_v37, 0.0 }
 0x1a1   :  { %v451_v38 = vpop.f32.mrf.mxu1 }
 0x1a2   :  { %v452_v39 = vadd.f32 %v2657_v57, %v451_v38 }
 0x1a4   :  { %v475_v41 = vmax.f32 %v452_v39, 0.0 }
 0x1a6   :  { %v485_v42 = vpack.c.bf16 %v475_v41, %v474_v40 }
 0x1a8   :  { %589 = vmatmul.bf16.gmra.mxu2 %v485_v42 }
 0x1a9   :  { %v454_v43 = vpop.f32.mrf.mxu1 }
 0x1aa   :  { %v455_v44 = vadd.f32 %v2657_v57, %v454_v43 }
 0x1ac   :  { %v476_v47 = vmax.f32 %v455_v44, 0.0 }
 0x1b1   :  { %v456_v45 = vpop.f32.mrf.mxu1 }
 0x1b2   :  { %v457_v46 = vadd.f32 %v2657_v57, %v456_v45 }
 0x1b4   :  { %v477_v48 = vmax.f32 %v457_v46, 0.0 }
 0x1b6   :  { %v486_v49 = vpack.c.bf16 %v477_v48, %v476_v47 }
 0x1b8   :  { %594 = vmatmul.bf16.gmra.mxu2 %v486_v49 }
 0x1b9   :  { %v459_v50 = vpop.f32.mrf.mxu1 }
 0x1ba   :  { %v460_v51 = vadd.f32 %v2657_v57, %v459_v50 }
 0x1bc   :  { %v478_v54 = vmax.f32 %v460_v51, 0.0 }
 0x1c1   :  { %v461_v52 = vpop.f32.mrf.mxu1 }
 0x1c2   :  { %v462_v53 = vadd.f32 %v2657_v57, %v461_v52  ;;  %v2555_v52 = vld [vmem:[#allocation11 + $0x78] sm:$0xff] }
 0x1c3   :  { %971 = vmatpush.bf16.msrb.mxu1 %v2555_v52 }
 0x1c4   :  { %v479_v55 = vmax.f32 %v462_v53, 0.0 }
 0x1c6   :  { %v487_v56 = vpack.c.bf16 %v479_v55, %v478_v54  ;;  %v2554_v55 = vld [vmem:[#allocation11 + $0x70] sm:$0xff] }
 0x1c7   :  { %972 = vmatpush.bf16.msrb.mxu1 %v2554_v55 }
 0x1c8   :  { %599 = vmatmul.bf16.gmra.mxu2 %v487_v56 }
 0x1db   :  { %v565_v59 = vpop.f32.mrf.mxu2 }
 0x1dc   :  { %v566_v60 = vadd.f32 %v3043_v58, %v565_v59 }
 0x1de   :  { %v605_v61 = vmax.f32 %v566_v60, 0.0  ;;  %v2553_v60 = vld [vmem:[#allocation11 + $0x68] sm:$0xff] }
 0x1df   :  { %973 = vmatpush.bf16.msrb.mxu1 %v2553_v60 }
 0x1e0   :  { %v621_v62 = vpack.c.bf16 %v605_v61, %v605_v61 }
 0x1e2   :  { %637 = vst [vmem:[#allocation2] sm:$0xf] %v621_v62  ;;  %v669_v3 = vunpack.c.l.b16 %v621_v62 }
 0x1e3   :  { %v567_v63 = vpop.f32.mrf.mxu2 }
 0x1e4   :  { %v568_v0 = vadd.f32 %v3043_v58, %v567_v63  ;;  %v2552_v63 = vld [vmem:[#allocation11 + $0x60] sm:$0xff] }
 0x1e5   :  { %974 = vmatpush.bf16.msrb.mxu1 %v2552_v63 }
 0x1e6   :  { %v606_v1 = vmax.f32 %v568_v0, 0.0 }
 0x1e8   :  { %v622_v2 = vpack.c.bf16 %v606_v1, %v606_v1 }
 0x1ea   :  { %638 = vst [vmem:[#allocation2 + $0xc] sm:$0xf] %v622_v2  ;;  %v670_v57 = vunpack.c.l.b16 %v622_v2  ;;  %v2551_v2 = vld [vmem:[#allocation11 + $0x58] sm:$0xff] }
 0x1eb   :  { %v570_v4 = vpop.f32.mrf.mxu2  ;;  %975 = vmatpush.bf16.msrb.mxu1 %v2551_v2 }
 0x1ec   :  { %v571_v5 = vadd.f32 %v3043_v58, %v570_v4  ;;  %v3048_v6 = vpack.c.b16 %v670_v57, %v669_v3  ;;  %v2550_v4 = vld [vmem:[#allocation11 + $0x50] sm:$0xff] }
 0x1ee   :  { %v607_v7 = vmax.f32 %v571_v5, 0.0 }
 0x1ef   :  { %976 = vmatpush.bf16.msrb.mxu1 %v2550_v4  ;;  %v2286_v4 = vld [vmem:[#allocation2] sm:$0xf] }
 0x1f0   :  { %v623_v13 = vpack.c.bf16 %v607_v7, %v607_v7 }
 0x1f2   :  { %639 = vst [vmem:[#allocation2 + $0x18] sm:$0xf] %v623_v13  ;;  %v671_v21 = vunpack.c.l.b16 %v623_v13  ;;  %v2549_v13 = vld [vmem:[#allocation11 + $0x48] sm:$0xff] }
 0x1f3   :  { %v572_v14 = vpop.f32.mrf.mxu2  ;;  %977 = vmatpush.bf16.msrb.mxu1 %v2549_v13 }
 0x1f4   :  { %v573_v15 = vadd.f32 %v3043_v58, %v572_v14 }
 0x1f6   :  { %v608_v16 = vmax.f32 %v573_v15, 0.0 }
 0x1f8   :  { %v624_v19 = vpack.c.bf16 %v608_v16, %v608_v16  ;;  %v2548_v16 = vld [vmem:[#allocation11 + $0x40] sm:$0xff] }
 0x1f9   :  { %978 = vmatpush.bf16.msrb.mxu1 %v2548_v16 }
 0x1fa   :  { %640 = vst [vmem:[#allocation2 + $0x24] sm:$0xf] %v624_v19  ;;  %v672_v22 = vunpack.c.l.b16 %v624_v19 }
 0x1fb   :  { %v575_v23 = vpop.f32.mrf.mxu2 }
 0x1fc   :  { %v576_v24 = vadd.f32 %v3043_v58, %v575_v23  ;;  %v3052_v25 = vpack.c.b16 %v672_v22, %v671_v21 }
 0x1fe   :  { %v609_v26 = vmax.f32 %v576_v24, 0.0 }
 0x200   :  { %v625_v27 = vpack.c.bf16 %v609_v26, %v609_v26 }
 0x201   :  { %v2576_v2 = vld [vmem:[#allocation2 + $0x20] sm:$0xf0] }
 0x202   :  { %641 = vst [vmem:[#allocation2 + $0x30] sm:$0xf] %v625_v27  ;;  %v673_v32 = vunpack.c.l.b16 %v625_v27 }
 0x203   :  { %v577_v28 = vpop.f32.mrf.mxu2 }
 0x204   :  { %v578_v29 = vadd.f32 %v3043_v58, %v577_v28 }
 0x206   :  { %v610_v30 = vmax.f32 %v578_v29, 0.0 }
 0x208   :  { %v626_v31 = vpack.c.bf16 %v610_v30, %v610_v30 }
 0x20a   :  { %642 = vst [vmem:[#allocation2 + $0x3c] sm:$0xf] %v626_v31  ;;  %v674_v33 = vunpack.c.l.b16 %v626_v31 }
 0x20b   :  { %v580_v34 = vpop.f32.mrf.mxu2 }
 0x20c   :  { %v581_v35 = vadd.f32 %v3043_v58, %v580_v34  ;;  %v3056_v36 = vpack.c.b16 %v674_v33, %v673_v32 }
 0x20e   :  { %v611_v37 = vmax.f32 %v581_v35, 0.0 }
 0x210   :  { %v627_v38 = vpack.c.bf16 %v611_v37, %v611_v37 }
 0x212   :  { %643 = vst [vmem:[#allocation2 + $0x48] sm:$0xf] %v627_v38  ;;  %v675_v43 = vunpack.c.l.b16 %v627_v38 }
 0x213   :  { %v582_v39 = vpop.f32.mrf.mxu2 }
 0x214   :  { %v583_v40 = vadd.f32 %v3043_v58, %v582_v39 }
 0x216   :  { %v612_v41 = vmax.f32 %v583_v40, 0.0 }
 0x218   :  { %v628_v42 = vpack.c.bf16 %v612_v41, %v612_v41 }
 0x21a   :  { %644 = vst [vmem:[#allocation2 + $0x54] sm:$0xf] %v628_v42  ;;  %v676_v44 = vunpack.c.l.b16 %v628_v42 }
 0x21b   :  { %v585_v45 = vpop.f32.mrf.mxu2 }
 0x21c   :  { %v586_v46 = vadd.f32 %v3043_v58, %v585_v45  ;;  %v3060_v47 = vpack.c.b16 %v676_v44, %v675_v43 }
 0x21e   :  { %v613_v48 = vmax.f32 %v586_v46, 0.0 }
 0x220   :  { %v3062_v49 = vpack.c.bf16 %v613_v48, %v613_v48 }
 0x222   :  { %645 = vst [vmem:[#allocation2 + $0x60] sm:$0xf] %v3062_v49 }
 0x223   :  { %v587_v50 = vpop.f32.mrf.mxu2 }
 0x224   :  { %v588_v51 = vadd.f32 %v3043_v58, %v587_v50 }
 0x226   :  { %v614_v53 = vmax.f32 %v588_v51, 0.0  ;;  %v677_v51 = vunpack.c.l.b16 %v3062_v49  ;;  %v2310_v49 = vld [vmem:[#allocation2 + $0x30] sm:$0xf] }
 0x228   :  { %v3066_v54 = vpack.c.bf16 %v614_v53, %v614_v53 }
 0x229   :  { %v2334_v60 = vld [vmem:[#allocation2 + $0x60] sm:$0xf] }
 0x22a   :  { %646 = vst [vmem:[#allocation2 + $0x6c] sm:$0xf] %v3066_v54 }
 0x22b   :  { %v590_v56 = vpop.f32.mrf.mxu2 }
 0x22c   :  { %v591_v59 = vadd.f32 %v3043_v58, %v590_v56 }
 0x22e   :  { %v615_v61 = vmax.f32 %v591_v59, 0.0 }
 0x230   :  { %v631_v62 = vpack.c.bf16 %v615_v61, %v615_v61 }
 0x231   :  { %v2585_v59 = vld [vmem:[#allocation2 + $0x68] sm:$0xf0] }
 0x232   :  { %647 = vst [vmem:[#allocation2 + $0x78] sm:$0xf] %v631_v62  ;;  %v679_v44 = vunpack.c.l.b16 %v631_v62  ;;  %v2335_v61 = vor.u32 %v2585_v59, %v2334_v60  ;;  %v2582_v62 = vld [vmem:[#allocation2 + $0x50] sm:$0xf0] }
 0x233   :  { %v592_v0 = vpop.f32.mrf.mxu2 }
 0x234   :  { %v593_v1 = vadd.f32 %v3043_v58, %v592_v0  ;;  %v2579_v0 = vld [vmem:[#allocation2 + $0x38] sm:$0xf0] }
 0x236   :  { %v616_v3 = vmax.f32 %v593_v1, 0.0  ;;  %v2311_v1 = vor.u32 %v2579_v0, %v2310_v49 }
 0x238   :  { %v632_v57 = vpack.c.bf16 %v616_v3, %v616_v3  ;;  %v2298_v3 = vld [vmem:[#allocation2 + $0x18] sm:$0xf] }
 0x239   :  { %v2346_v55 = vld [vmem:[#allocation2 + $0x78] sm:$0xf] }
 0x23a   :  { %648 = vst [vmem:[#allocation2 + $0x84] sm:$0xf] %v632_v57  ;;  %v680_v40 = vunpack.c.l.b16 %v632_v57  ;;  %v2299_v57 = vor.u32 %v2576_v2, %v2298_v3 }
 0x23b   :  { %v595_v5 = vpop.f32.mrf.mxu2 }
 0x23c   :  { %v596_v7 = vadd.f32 %v3043_v58, %v595_v5  ;;  %v690_v46 = vpack.c.b16 %v680_v40, %v679_v44 }
 0x23e   :  { %v617_v14 = vmax.f32 %v596_v7, 0.0  ;;  %v2543_v7 = vld [vmem:[#allocation9 + $0x58] sm:$0xff] }
 0x240   :  { %v633_v15 = vpack.c.bf16 %v617_v14, %v617_v14 }
 0x241   :  { %v2588_v52 = vld [vmem:[#allocation2 + $0x80] sm:$0xf0] }
 0x242   :  { %649 = vst [vmem:[#allocation2 + $0x90] sm:$0xf] %v633_v15  ;;  %v681_v38 = vunpack.c.l.b16 %v633_v15  ;;  %v2347_v56 = vor.u32 %v2588_v52, %v2346_v55 }
 0x243   :  { %v597_v19 = vpop.f32.mrf.mxu2 }
 0x244   :  { %v598_v21 = vadd.f32 %v3043_v58, %v597_v19 }
 0x246   :  { %v618_v22 = vmax.f32 %v598_v21, 0.0 }
 0x248   :  { %v634_v23 = vpack.c.bf16 %v618_v22, %v618_v22 }
 0x249   :  { %v2358_v48 = vld [vmem:[#allocation2 + $0x90] sm:$0xf] }
 0x24a   :  { %650 = vst [vmem:[#allocation2 + $0x9c] sm:$0xf] %v634_v23  ;;  %v682_v37 = vunpack.c.l.b16 %v634_v23 }
 0x24b   :  { %v600_v24 = vpop.f32.mrf.mxu2 }
 0x24c   :  { %v601_v26 = vadd.f32 %v3043_v58, %v600_v24  ;;  %v691_v39 = vpack.c.b16 %v682_v37, %v681_v38 }
 0x24e   :  { %v619_v27 = vmax.f32 %v601_v26, 0.0 }
 0x250   :  { %v635_v28 = vpack.c.bf16 %v619_v27, %v619_v27 }
 0x251   :  { %v2591_v45 = vld [vmem:[#allocation2 + $0x98] sm:$0xf0] }
 0x252   :  { %651 = vst [vmem:[#allocation2 + $0xa8] sm:$0xf] %v635_v28  ;;  %v683_v33 = vunpack.c.l.b16 %v635_v28  ;;  %v2359_v50 = vor.u32 %v2591_v45, %v2358_v48 }
 0x253   :  { %v602_v29 = vpop.f32.mrf.mxu2 }
 0x254   :  { %v603_v30 = vadd.f32 %v3043_v58, %v602_v29  ;;  %v678_v58 = vunpack.c.l.b16 %v3066_v54  ;;  %v2322_v54 = vld [vmem:[#allocation2 + $0x48] sm:$0xf] }
 0x255   :  { %v2323_v63 = vor.u32 %v2582_v62, %v2322_v54 }
 0x256   :  { %v620_v31 = vmax.f32 %v603_v30, 0.0  ;;  %v689_v53 = vpack.c.b16 %v678_v58, %v677_v51 }
 0x258   :  { %v636_v32 = vpack.c.bf16 %v620_v31, %v620_v31 }
 0x259   :  { %v2370_v41 = vld [vmem:[#allocation2 + $0xa8] sm:$0xf] }
 0x25a   :  { %652 = vst [vmem:[#allocation2 + $0xb4] sm:$0xf] %v636_v32  ;;  %v684_v34 = vunpack.c.l.b16 %v636_v32 }
 0x25c   :  { %v692_v35 = vpack.c.b16 %v684_v34, %v683_v33 }
 0x25e   :  { %701 = vmatpush.bf16.msrb.mxu3 %v692_v35 }
 0x261   :  { %v2594_v42 = vld [vmem:[#allocation2 + $0xb0] sm:$0xf0] }
 0x262   :  { %702 = vmatpush.bf16.msrb.mxu3 %v691_v39  ;;  %v2371_v43 = vor.u32 %v2594_v42, %v2370_v41  ;;  %v2659_v39 = vld [vmem:[%s3158_s4 + $0x1] ss:$0 sm:$0xff] }
 0x264   :  { %1644 = vmatpush.bf16.msra.mxu1 %v2371_v43 }
 0x266   :  { %703 = vmatpush.bf16.msrb.mxu3 %v690_v46 }
 0x268   :  { %1645 = vmatpush.bf16.msra.mxu1 %v2359_v50 }
 0x26a   :  { %704 = vmatpush.bf16.msrb.mxu3 %v689_v53 }
 0x26c   :  { %1646 = vmatpush.bf16.msra.mxu1 %v2347_v56 }
 0x26e   :  { %705 = vmatpush.bf16.msrb.mxu3 %v3060_v47  ;;  %v2573_v47 = vld [vmem:[#allocation2 + $0x8] sm:$0xf0] }
 0x26f   :  { %v2287_v5 = vor.u32 %v2573_v47, %v2286_v4 }
 0x270   :  { %1647 = vmatpush.bf16.msra.mxu1 %v2335_v61 }
 0x272   :  { %706 = vmatpush.bf16.msrb.mxu3 %v3056_v36  ;;  %v2545_v36 = vld [vmem:[#allocation9 + $0x68] sm:$0xff] }
 0x274   :  { %1648 = vmatpush.bf16.msra.mxu1 %v2323_v63 }
 0x276   :  { %707 = vmatpush.bf16.msrb.mxu3 %v3052_v25  ;;  %v2547_v25 = vld [vmem:[#allocation9 + $0x78] sm:$0xff] }
 0x277   :  { %828 = vmatpush.bf16.msrb.mxu0 %v2547_v25 }
 0x278   :  { %1649 = vmatpush.bf16.msra.mxu1 %v2311_v1 }
 0x27a   :  { %708 = vmatpush.bf16.msrb.mxu3 %v3048_v6  ;;  %v2546_v6 = vld [vmem:[#allocation9 + $0x70] sm:$0xff] }
 0x27b   :  { %829 = vmatpush.bf16.msrb.mxu0 %v2546_v6 }
 0x27c   :  { %1650 = vmatpush.bf16.msra.mxu1 %v2299_v57 }
 0x27d   :  { %709 = vmatmul.bf16.vlgmr.msrb.gmra.mxu3 %v3016_v8  ;;  %v2544_v8 = vld [vmem:[#allocation9 + $0x60] sm:$0xff] }
 0x27f   :  { %830 = vmatpush.bf16.msrb.mxu0 %v2545_v36 }
 0x280   :  { %1651 = vmatpush.bf16.msra.mxu1 %v2287_v5 }
 0x283   :  { %831 = vmatpush.bf16.msrb.mxu0 %v2544_v8 }
 0x287   :  { %832 = vmatpush.bf16.msrb.mxu0 %v2543_v7 }
 0x28d   :  { %714 = vmatmul.bf16.gmra.mxu3 %v3019_v9  ;;  %v2542_v9 = vld [vmem:[#allocation9 + $0x50] sm:$0xff] }
 0x28e   :  { %833 = vmatpush.bf16.msrb.mxu0 %v2542_v9 }
 0x29d   :  { %719 = vmatmul.bf16.gmra.mxu3 %v3022_v10  ;;  %v2541_v10 = vld [vmem:[#allocation9 + $0x48] sm:$0xff] }
 0x29e   :  { %834 = vmatpush.bf16.msrb.mxu0 %v2541_v10 }
 0x2ad   :  { %724 = vmatmul.bf16.gmra.mxu3 %v3031_v17  ;;  %v2540_v17 = vld [vmem:[#allocation9 + $0x40] sm:$0xff] }
 0x2ae   :  { %835 = vmatpush.bf16.msrb.mxu0 %v2540_v17 }
 0x2bd   :  { %729 = vmatmul.bf16.gmra.mxu3 %v3037_v20 }
 0x2cd   :  { %734 = vmatmul.bf16.gmra.mxu3 %v3025_v11 }
 0x2dd   :  { %739 = vmatmul.bf16.gmra.mxu3 %v3033_v18 }
 0x2ed   :  { %744 = vmatmul.bf16.gmra.mxu3 %v3027_v12 }
 0x300   :  { %v710_v20 = vpop.f32.mrf.mxu3 }
 0x308   :  { %v712_v11 = vpop.f32.mrf.mxu3 }
 0x309   :  { %v750_v13 = vpack.c.bf16 %v712_v11, %v710_v20 }
 0x30b   :  { %836 = vmatmul.bf16.vlgmr.msrb.gmra.mxu0 %v750_v13 }
 0x310   :  { %v715_v14 = vpop.f32.mrf.mxu3 }
 0x318   :  { %v717_v15 = vpop.f32.mrf.mxu3 }
 0x319   :  { %v751_v16 = vpack.c.bf16 %v717_v15, %v715_v14 }
 0x31b   :  { %841 = vmatmul.bf16.gmra.mxu0 %v751_v16 }
 0x320   :  { %v720_v19 = vpop.f32.mrf.mxu3 }
 0x328   :  { %v722_v21 = vpop.f32.mrf.mxu3 }
 0x329   :  { %v752_v22 = vpack.c.bf16 %v722_v21, %v720_v19 }
 0x32b   :  { %846 = vmatmul.bf16.gmra.mxu0 %v752_v22 }
 0x330   :  { %v725_v18 = vpop.f32.mrf.mxu3 }
 0x338   :  { %v727_v23 = vpop.f32.mrf.mxu3 }
 0x339   :  { %v753_v24 = vpack.c.bf16 %v727_v23, %v725_v18 }
 0x33b   :  { %851 = vmatmul.bf16.gmra.mxu0 %v753_v24 }
 0x340   :  { %v730_v26 = vpop.f32.mrf.mxu3 }
 0x348   :  { %v732_v27 = vpop.f32.mrf.mxu3 }
 0x349   :  { %v754_v28 = vpack.c.bf16 %v732_v27, %v730_v26 }
 0x34b   :  { %856 = vmatmul.bf16.gmra.mxu0 %v754_v28 }
 0x350   :  { %v735_v12 = vpop.f32.mrf.mxu3 }
 0x358   :  { %v737_v29 = vpop.f32.mrf.mxu3 }
 0x359   :  { %v755_v30 = vpack.c.bf16 %v737_v29, %v735_v12 }
 0x35b   :  { %861 = vmatmul.bf16.gmra.mxu0 %v755_v30  ;;  %v3092_v30 = vld [vmem:[#allocation12 + $0x1] ss:$0 sm:$0xff] }
 0x360   :  { %v740_v31 = vpop.f32.mrf.mxu3 }
 0x368   :  { %v742_v32 = vpop.f32.mrf.mxu3 }
 0x369   :  { %v756_v33 = vpack.c.bf16 %v742_v32, %v740_v31 }
 0x36b   :  { %866 = vmatmul.bf16.gmra.mxu0 %v756_v33 }
 0x370   :  { %v745_v34 = vpop.f32.mrf.mxu3 }
 0x378   :  { %v747_v35 = vpop.f32.mrf.mxu3 }
 0x379   :  { %v757_v37 = vpack.c.bf16 %v747_v35, %v745_v34 }
 0x37b   :  { %871 = vmatmul.bf16.gmra.mxu0 %v757_v37 }
 0x388   :  { %v837_v38 = vpop.f32.mrf.mxu0 }
 0x389   :  { %v838_v40 = vadd.f32 %v2659_v39, %v837_v38 }
 0x38b   :  { %v877_v43 = vmax.f32 %v838_v40, 0.0 }
 0x390   :  { %v839_v41 = vpop.f32.mrf.mxu0 }
 0x391   :  { %v840_v42 = vadd.f32 %v2659_v39, %v839_v41 }
 0x393   :  { %v878_v44 = vmax.f32 %v840_v42, 0.0 }
 0x395   :  { %v893_v45 = vpack.c.bf16 %v878_v44, %v877_v43 }
 0x397   :  { %979 = vmatmul.bf16.vlgmr.msrb.gmra.mxu1 %v893_v45 }
 0x398   :  { %v842_v46 = vpop.f32.mrf.mxu0 }
 0x399   :  { %v843_v58 = vadd.f32 %v2659_v39, %v842_v46 }
 0x39b   :  { %v879_v51 = vmax.f32 %v843_v58, 0.0 }
 0x3a0   :  { %v844_v48 = vpop.f32.mrf.mxu0 }
 0x3a1   :  { %v845_v50 = vadd.f32 %v2659_v39, %v844_v48 }
 0x3a3   :  { %v880_v52 = vmax.f32 %v845_v50, 0.0 }
 0x3a5   :  { %v894_v53 = vpack.c.bf16 %v880_v52, %v879_v51 }
 0x3a7   :  { %984 = vmatmul.bf16.gmra.mxu1 %v894_v53 }
 0x3a8   :  { %v847_v55 = vpop.f32.mrf.mxu0 }
 0x3a9   :  { %v848_v56 = vadd.f32 %v2659_v39, %v847_v55 }
 0x3ab   :  { %v881_v61 = vmax.f32 %v848_v56, 0.0 }
 0x3b0   :  { %v849_v59 = vpop.f32.mrf.mxu0 }
 0x3b1   :  { %v850_v60 = vadd.f32 %v2659_v39, %v849_v59 }
 0x3b3   :  { %v882_v62 = vmax.f32 %v850_v60, 0.0 }
 0x3b5   :  { %v895_v54 = vpack.c.bf16 %v882_v62, %v881_v61 }
 0x3b7   :  { %989 = vmatmul.bf16.gmra.mxu1 %v895_v54 }
 0x3b8   :  { %v852_v63 = vpop.f32.mrf.mxu0 }
 0x3b9   :  { %v853_v0 = vadd.f32 %v2659_v39, %v852_v63 }
 0x3bb   :  { %v883_v2 = vmax.f32 %v853_v0, 0.0 }
 0x3c0   :  { %v854_v49 = vpop.f32.mrf.mxu0 }
 0x3c1   :  { %v855_v1 = vadd.f32 %v2659_v39, %v854_v49 }
 0x3c3   :  { %v884_v3 = vmax.f32 %v855_v1, 0.0 }
 0x3c5   :  { %v896_v57 = vpack.c.bf16 %v884_v3, %v883_v2 }
 0x3c7   :  { %994 = vmatmul.bf16.gmra.mxu1 %v896_v57 }
 0x3c8   :  { %v857_v47 = vpop.f32.mrf.mxu0 }
 0x3c9   :  { %v858_v4 = vadd.f32 %v2659_v39, %v857_v47 }
 0x3cb   :  { %v885_v6 = vmax.f32 %v858_v4, 0.0 }
 0x3d0   :  { %v859_v5 = vpop.f32.mrf.mxu0 }
 0x3d1   :  { %v860_v25 = vadd.f32 %v2659_v39, %v859_v5 }
 0x3d3   :  { %v886_v36 = vmax.f32 %v860_v25, 0.0 }
 0x3d5   :  { %v897_v8 = vpack.c.bf16 %v886_v36, %v885_v6 }
 0x3d7   :  { %999 = vmatmul.bf16.gmra.mxu1 %v897_v8 }
 0x3d8   :  { %v862_v7 = vpop.f32.mrf.mxu0 }
 0x3d9   :  { %v863_v9 = vadd.f32 %v2659_v39, %v862_v7 }
 0x3db   :  { %v887_v20 = vmax.f32 %v863_v9, 0.0 }
 0x3e0   :  { %v864_v10 = vpop.f32.mrf.mxu0 }
 0x3e1   :  { %v865_v17 = vadd.f32 %v2659_v39, %v864_v10 }
 0x3e3   :  { %v888_v11 = vmax.f32 %v865_v17, 0.0 }
 0x3e5   :  { %v898_v13 = vpack.c.bf16 %v888_v11, %v887_v20 }
 0x3e7   :  { %1004 = vmatmul.bf16.gmra.mxu1 %v898_v13 }
 0x3e8   :  { %v867_v14 = vpop.f32.mrf.mxu0 }
 0x3e9   :  { %v868_v15 = vadd.f32 %v2659_v39, %v867_v14 }
 0x3eb   :  { %v889_v21 = vmax.f32 %v868_v15, 0.0 }
 0x3f0   :  { %v869_v16 = vpop.f32.mrf.mxu0 }
 0x3f1   :  { %v870_v19 = vadd.f32 %v2659_v39, %v869_v16 }
 0x3f3   :  { %v890_v22 = vmax.f32 %v870_v19, 0.0 }
 0x3f5   :  { %v899_v18 = vpack.c.bf16 %v890_v22, %v889_v21 }
 0x3f7   :  { %1009 = vmatmul.bf16.gmra.mxu1 %v899_v18 }
 0x3f8   :  { %v872_v23 = vpop.f32.mrf.mxu0 }
 0x3f9   :  { %v873_v24 = vadd.f32 %v2659_v39, %v872_v23 }
 0x3fb   :  { %v891_v28 = vmax.f32 %v873_v24, 0.0 }
 0x400   :  { %v874_v26 = vpop.f32.mrf.mxu0 }
 0x401   :  { %v875_v27 = vadd.f32 %v2659_v39, %v874_v26 }
 0x403   :  { %v892_v12 = vmax.f32 %v875_v27, 0.0 }
 0x405   :  { %v900_v29 = vpack.c.bf16 %v892_v12, %v891_v28 }
 0x407   :  { %1014 = vmatmul.bf16.gmra.mxu1 %v900_v29 }
 0x414   :  { %v980_v31 = vpop.f32.mrf.mxu1 }
 0x415   :  { %v981_v32 = vadd.f32 %v3092_v30, %v980_v31 }
 0x417   :  { %v1020_v33 = vmax.f32 %v981_v32, 0.0 }
 0x419   :  { %v1036_v34 = vpack.c.bf16 %v1020_v33, %v1020_v33 }
 0x41b   :  { %1052 = vst [vmem:[#allocation2 + $0x4] sm:$0xf] %v1036_v34  ;;  %v1084_v41 = vunpack.c.l.b16 %v1036_v34 }
 0x41c   :  { %v982_v35 = vpop.f32.mrf.mxu1 }
 0x41d   :  { %v983_v37 = vadd.f32 %v3092_v30, %v982_v35 }
 0x41f   :  { %v1021_v38 = vmax.f32 %v983_v37, 0.0 }
 0x421   :  { %v1037_v40 = vpack.c.bf16 %v1021_v38, %v1021_v38 }
 0x423   :  { %1053 = vst [vmem:[#allocation2 + $0x10] sm:$0xf] %v1037_v40  ;;  %v1085_v39 = vunpack.c.l.b16 %v1037_v40 }
 0x424   :  { %v985_v42 = vpop.f32.mrf.mxu1 }
 0x425   :  { %v986_v43 = vadd.f32 %v3092_v30, %v985_v42  ;;  %v3097_v44 = vpack.c.b16 %v1085_v39, %v1084_v41 }
 0x427   :  { %v1022_v45 = vmax.f32 %v986_v43, 0.0 }
 0x429   :  { %v1038_v46 = vpack.c.bf16 %v1022_v45, %v1022_v45 }
 0x42b   :  { %1054 = vst [vmem:[#allocation2 + $0x1c] sm:$0xf] %v1038_v46  ;;  %v1086_v52 = vunpack.c.l.b16 %v1038_v46 }
 0x42c   :  { %v987_v58 = vpop.f32.mrf.mxu1 }
 0x42d   :  { %v988_v48 = vadd.f32 %v3092_v30, %v987_v58 }
 0x42f   :  { %v1023_v50 = vmax.f32 %v988_v48, 0.0 }
 0x431   :  { %v1039_v51 = vpack.c.bf16 %v1023_v50, %v1023_v50 }
 0x433   :  { %1055 = vst [vmem:[#allocation2 + $0x28] sm:$0xf] %v1039_v51  ;;  %v1087_v53 = vunpack.c.l.b16 %v1039_v51 }
 0x434   :  { %v990_v55 = vpop.f32.mrf.mxu1 }
 0x435   :  { %v991_v56 = vadd.f32 %v3092_v30, %v990_v55  ;;  %v3101_v59 = vpack.c.b16 %v1087_v53, %v1086_v52 }
 0x437   :  { %v1024_v60 = vmax.f32 %v991_v56, 0.0 }
 0x439   :  { %v1040_v61 = vpack.c.bf16 %v1024_v60, %v1024_v60 }
 0x43b   :  { %1056 = vst [vmem:[#allocation2 + $0x34] sm:$0xf] %v1040_v61  ;;  %v1088_v49 = vunpack.c.l.b16 %v1040_v61 }
 0x43c   :  { %v992_v62 = vpop.f32.mrf.mxu1 }
 0x43d   :  { %v993_v54 = vadd.f32 %v3092_v30, %v992_v62 }
 0x43f   :  { %v1025_v63 = vmax.f32 %v993_v54, 0.0 }
 0x441   :  { %v1041_v0 = vpack.c.bf16 %v1025_v63, %v1025_v63 }
 0x443   :  { %1057 = vst [vmem:[#allocation2 + $0x40] sm:$0xf] %v1041_v0  ;;  %v1089_v1 = vunpack.c.l.b16 %v1041_v0 }
 0x444   :  { %v995_v2 = vpop.f32.mrf.mxu1 }
 0x445   :  { %v996_v3 = vadd.f32 %v3092_v30, %v995_v2  ;;  %v3105_v57 = vpack.c.b16 %v1089_v1, %v1088_v49  ;;  %v2665_v1 = vld [vmem:[#allocation3] sm:$0xff] }
 0x447   :  { %v1026_v47 = vmax.f32 %v996_v3, 0.0 }
 0x449   :  { %v1042_v4 = vpack.c.bf16 %v1026_v47, %v1026_v47 }
 0x44b   :  { %1058 = vst [vmem:[#allocation2 + $0x4c] sm:$0xf] %v1042_v4  ;;  %v1090_v8 = vunpack.c.l.b16 %v1042_v4 }
 0x44c   :  { %v997_v5 = vpop.f32.mrf.mxu1 }
 0x44d   :  { %v998_v25 = vadd.f32 %v3092_v30, %v997_v5 }
 0x44f   :  { %v1027_v6 = vmax.f32 %v998_v25, 0.0 }
 0x451   :  { %v1043_v36 = vpack.c.bf16 %v1027_v6, %v1027_v6 }
 0x452   :  { %v2581_v6 = vld [vmem:[#allocation2 + $0x4c] sm:$0xf] }
 0x453   :  { %1059 = vst [vmem:[#allocation2 + $0x58] sm:$0xf] %v1043_v36  ;;  %v1091_v7 = vunpack.c.l.b16 %v1043_v36 }
 0x454   :  { %v1000_v9 = vpop.f32.mrf.mxu1 }
 0x455   :  { %v1001_v10 = vadd.f32 %v3092_v30, %v1000_v9  ;;  %v1103_v17 = vpack.c.b16 %v1091_v7, %v1090_v8  ;;  %v2312_v8 = vld [vmem:[#allocation2 + $0x3c] sm:$0xf0]  ;;  %v2666_v7 = vld [vmem:[#allocation3 + $0x8] sm:$0xff] }
 0x457   :  { %v1028_v20 = vmax.f32 %v1001_v10, 0.0  ;;  %v2300_v10 = vld [vmem:[#allocation2 + $0x24] sm:$0xf0] }
 0x459   :  { %v1044_v11 = vpack.c.bf16 %v1028_v20, %v1028_v20 }
 0x45b   :  { %1060 = vst [vmem:[#allocation2 + $0x64] sm:$0xf] %v1044_v11  ;;  %v1092_v61 = vunpack.c.l.b16 %v1044_v11  ;;  %v2288_v11 = vld [vmem:[#allocation2 + $0xc] sm:$0xf0] }
 0x45c   :  { %v1002_v13 = vpop.f32.mrf.mxu1 }
 0x45d   :  { %v1003_v14 = vadd.f32 %v3092_v30, %v1002_v13  ;;  %v2572_v13 = vld [vmem:[#allocation2 + $0x4] sm:$0xf] }
 0x45f   :  { %v1029_v15 = vmax.f32 %v1003_v14, 0.0  ;;  %v2291_v14 = vor.u32 %v2572_v13, %v2288_v11 }
 0x461   :  { %v1045_v16 = vpack.c.bf16 %v1029_v15, %v1029_v15  ;;  %v2667_v15 = vld [vmem:[#allocation3 + $0x10] sm:$0xff] }
 0x463   :  { %1061 = vst [vmem:[#allocation2 + $0x70] sm:$0xf] %v1045_v16  ;;  %v1093_v56 = vunpack.c.l.b16 %v1045_v16  ;;  %v2668_v16 = vld [vmem:[#allocation3 + $0x18] sm:$0xff] }
 0x464   :  { %v1005_v19 = vpop.f32.mrf.mxu1 }
 0x465   :  { %v1006_v21 = vadd.f32 %v3092_v30, %v1005_v19  ;;  %v1104_v62 = vpack.c.b16 %v1093_v56, %v1092_v61  ;;  %v2669_v19 = vld [vmem:[#allocation3 + $0x20] sm:$0xff] }
 0x466   :  { %v2568_v61 = vld [vmem:[#allocation11 + $0xa0] sm:$0xff] }
 0x467   :  { %v1030_v22 = vmax.f32 %v1006_v21, 0.0  ;;  %v2563_v21 = vld [vmem:[#allocation9 + $0xb8] sm:$0xff] }
 0x468   :  { %1243 = vmatpush.bf16.msra.mxu3 %v2563_v21 }
 0x469   :  { %v1046_v18 = vpack.c.bf16 %v1030_v22, %v1030_v22  ;;  %v2670_v22 = vld [vmem:[#allocation3 + $0x28] sm:$0xff] }
 0x46a   :  { %v2336_v5 = vld [vmem:[#allocation2 + $0x6c] sm:$0xf0] }
 0x46b   :  { %1062 = vst [vmem:[#allocation2 + $0x7c] sm:$0xf] %v1046_v18  ;;  %v1094_v55 = vunpack.c.l.b16 %v1046_v18  ;;  %v2562_v18 = vld [vmem:[#allocation9 + $0xb0] sm:$0xff] }
 0x46c   :  { %v1007_v23 = vpop.f32.mrf.mxu1  ;;  %1244 = vmatpush.bf16.msra.mxu3 %v2562_v18 }
 0x46d   :  { %v1008_v24 = vadd.f32 %v3092_v30, %v1007_v23  ;;  %v2561_v23 = vld [vmem:[#allocation9 + $0xa8] sm:$0xff] }
 0x46f   :  { %v1031_v26 = vmax.f32 %v1008_v24, 0.0  ;;  %v2560_v24 = vld [vmem:[#allocation9 + $0xa0] sm:$0xff] }
 0x470   :  { %1245 = vmatpush.bf16.msra.mxu3 %v2561_v23 }
 0x471   :  { %v1047_v27 = vpack.c.bf16 %v1031_v26, %v1031_v26  ;;  %v2559_v26 = vld [vmem:[#allocation9 + $0x98] sm:$0xff] }
 0x472   :  { %v2587_v47 = vld [vmem:[#allocation2 + $0x7c] sm:$0xf] }
 0x473   :  { %1063 = vst [vmem:[#allocation2 + $0x88] sm:$0xf] %v1047_v27  ;;  %v1095_v52 = vunpack.c.l.b16 %v1047_v27  ;;  %v2671_v27 = vld [vmem:[#allocation3 + $0x30] sm:$0xff] }
 0x474   :  { %v1010_v28 = vpop.f32.mrf.mxu1  ;;  %1246 = vmatpush.bf16.msra.mxu3 %v2560_v24 }
 0x475   :  { %v1011_v12 = vadd.f32 %v3092_v30, %v1010_v28  ;;  %v1105_v60 = vpack.c.b16 %v1095_v52, %v1094_v55  ;;  %v2558_v28 = vld [vmem:[#allocation9 + $0x90] sm:$0xff] }
 0x476   :  { %v2570_v55 = vld [vmem:[#allocation11 + $0xb0] sm:$0xff] }
 0x477   :  { %v1032_v29 = vmax.f32 %v1011_v12, 0.0  ;;  %v2557_v12 = vld [vmem:[#allocation9 + $0x88] sm:$0xff] }
 0x478   :  { %1247 = vmatpush.bf16.msra.mxu3 %v2559_v26 }
 0x479   :  { %v1048_v31 = vpack.c.bf16 %v1032_v29, %v1032_v29  ;;  %v2556_v29 = vld [vmem:[#allocation9 + $0x80] sm:$0xff] }
 0x47a   :  { %v2348_v3 = vld [vmem:[#allocation2 + $0x84] sm:$0xf0] }
 0x47b   :  { %1064 = vst [vmem:[#allocation2 + $0x94] sm:$0xf] %v1048_v31  ;;  %v1096_v51 = vunpack.c.l.b16 %v1048_v31  ;;  %v2351_v4 = vor.u32 %v2587_v47, %v2348_v3  ;;  %v2672_v31 = vld [vmem:[#allocation3 + $0x38] sm:$0xff] }
 0x47c   :  { %v1012_v32 = vpop.f32.mrf.mxu1  ;;  %1248 = vmatpush.bf16.msra.mxu3 %v2558_v28 }
 0x47d   :  { %v1013_v33 = vadd.f32 %v3092_v30, %v1012_v32 }
 0x47f   :  { %v1033_v34 = vmax.f32 %v1013_v33, 0.0 }
 0x480   :  { %1249 = vmatpush.bf16.msra.mxu3 %v2557_v12 }
 0x481   :  { %v1049_v35 = vpack.c.bf16 %v1033_v34, %v1033_v34 }
 0x482   :  { %v2590_v49 = vld [vmem:[#allocation2 + $0x94] sm:$0xf] }
 0x483   :  { %1065 = vst [vmem:[#allocation2 + $0xa0] sm:$0xf] %v1049_v35  ;;  %v1097_v48 = vunpack.c.l.b16 %v1049_v35 }
 0x484   :  { %v1015_v37 = vpop.f32.mrf.mxu1  ;;  %1250 = vmatpush.bf16.msra.mxu3 %v2556_v29 }
 0x485   :  { %v1016_v38 = vadd.f32 %v3092_v30, %v1015_v37  ;;  %v1106_v53 = vpack.c.b16 %v1097_v48, %v1096_v51 }
 0x487   :  { %v1034_v40 = vmax.f32 %v1016_v38, 0.0 }
 0x489   :  { %v1050_v41 = vpack.c.bf16 %v1034_v40, %v1034_v40 }
 0x48a   :  { %v2360_v0 = vld [vmem:[#allocation2 + $0x9c] sm:$0xf0] }
 0x48b   :  { %1066 = vst [vmem:[#allocation2 + $0xac] sm:$0xf] %v1050_v41  ;;  %v1098_v46 = vunpack.c.l.b16 %v1050_v41  ;;  %v2363_v2 = vor.u32 %v2590_v49, %v2360_v0  ;;  %v2566_v0 = vld [vmem:[#allocation11 + $0x90] sm:$0xff]  ;;  %v2565_v49 = vld [vmem:[#allocation11 + $0x88] sm:$0xff] }
 0x48c   :  { %v1017_v39 = vpop.f32.mrf.mxu1 }
 0x48d   :  { %v1018_v42 = vadd.f32 %v3092_v30, %v1017_v39 }
 0x48f   :  { %v1035_v43 = vmax.f32 %v1018_v42, 0.0 }
 0x491   :  { %v1051_v45 = vpack.c.bf16 %v1035_v43, %v1035_v43 }
 0x492   :  { %v2593_v54 = vld [vmem:[#allocation2 + $0xac] sm:$0xf] }
 0x493   :  { %1067 = vst [vmem:[#allocation2 + $0xb8] sm:$0xf] %v1051_v45  ;;  %v1099_v58 = vunpack.c.l.b16 %v1051_v45 }
 0x495   :  { %v1107_v50 = vpack.c.b16 %v1099_v58, %v1098_v46 }
 0x497   :  { %1116 = vmatpush.bf16.msra.mxu2 %v1107_v50 }
 0x49a   :  { %v2372_v30 = vld [vmem:[#allocation2 + $0xb4] sm:$0xf0] }
 0x49b   :  { %1117 = vmatpush.bf16.msra.mxu2 %v1106_v53  ;;  %v2375_v63 = vor.u32 %v2593_v54, %v2372_v30  ;;  %v2571_v53 = vld [vmem:[#allocation11 + $0xb8] sm:$0xff] }
 0x49c   :  { %1386 = vmatpush.bf16.msra.mxu0 %v2571_v53  ;;  %v2567_v54 = vld [vmem:[#allocation11 + $0x98] sm:$0xff] }
 0x49f   :  { %1118 = vmatpush.bf16.msra.mxu2 %v1105_v60  ;;  %v2569_v60 = vld [vmem:[#allocation11 + $0xa8] sm:$0xff] }
 0x4a0   :  { %1387 = vmatpush.bf16.msra.mxu0 %v2570_v55 }
 0x4a3   :  { %1119 = vmatpush.bf16.msra.mxu2 %v1104_v62 }
 0x4a4   :  { %1388 = vmatpush.bf16.msra.mxu0 %v2569_v60 }
 0x4a7   :  { %1120 = vmatpush.bf16.msra.mxu2 %v1103_v17  ;;  %v2575_v17 = vld [vmem:[#allocation2 + $0x1c] sm:$0xf] }
 0x4a8   :  { %v2303_v20 = vor.u32 %v2575_v17, %v2300_v10  ;;  %1389 = vmatpush.bf16.msra.mxu0 %v2568_v61 }
 0x4ab   :  { %1121 = vmatpush.bf16.msra.mxu2 %v3105_v57  ;;  %v2584_v57 = vld [vmem:[#allocation2 + $0x64] sm:$0xf] }
 0x4ac   :  { %v2339_v25 = vor.u32 %v2584_v57, %v2336_v5  ;;  %1390 = vmatpush.bf16.msra.mxu0 %v2567_v54  ;;  %v3122_v54 = vld [vmem:[#allocation12 + $0x2] ss:$0 sm:$0xff] }
 0x4af   :  { %1122 = vmatpush.bf16.msra.mxu2 %v3101_v59  ;;  %v2324_v59 = vld [vmem:[#allocation2 + $0x54] sm:$0xf0] }
 0x4b0   :  { %v2327_v36 = vor.u32 %v2581_v6, %v2324_v59  ;;  %1391 = vmatpush.bf16.msra.mxu0 %v2566_v0 }
 0x4b3   :  { %1123 = vmatpush.bf16.msra.mxu2 %v3097_v44  ;;  %v2578_v44 = vld [vmem:[#allocation2 + $0x34] sm:$0xf] }
 0x4b4   :  { %v2315_v9 = vor.u32 %v2578_v44, %v2312_v8  ;;  %1392 = vmatpush.bf16.msra.mxu0 %v2565_v49 }
 0x4b6   :  { %1124 = vmatmul.bf16.vlgmr.msra.gmra.mxu2 %v2665_v1 }
 0x4b7   :  { %1657 = vmatpush.bf16.msrb.mxu2 %v2375_v63 }
 0x4bb   :  { %1658 = vmatpush.bf16.msrb.mxu2 %v2363_v2  ;;  %v2564_v2 = vld [vmem:[#allocation11 + $0x80] sm:$0xff] }
 0x4bc   :  { %1393 = vmatpush.bf16.msra.mxu0 %v2564_v2 }
 0x4bf   :  { %1659 = vmatpush.bf16.msrb.mxu2 %v2351_v4  ;;  %v2661_v4 = vld [vmem:[%s3158_s4 + $0x2] ss:$0 sm:$0xff] }
 0x4c3   :  { %1660 = vmatpush.bf16.msrb.mxu2 %v2339_v25 }
 0x4c6   :  { %1129 = vmatmul.bf16.gmra.mxu2 %v2666_v7 }
 0x4c7   :  { %1661 = vmatpush.bf16.msrb.mxu2 %v2327_v36 }
 0x4cb   :  { %1662 = vmatpush.bf16.msrb.mxu2 %v2315_v9 }
 0x4cf   :  { %1663 = vmatpush.bf16.msrb.mxu2 %v2303_v20 }
 0x4d3   :  { %1664 = vmatpush.bf16.msrb.mxu2 %v2291_v14 }
 0x4d6   :  { %1134 = vmatmul.bf16.gmra.mxu2 %v2667_v15 }
 0x4e6   :  { %1139 = vmatmul.bf16.gmra.mxu2 %v2668_v16 }
 0x4f6   :  { %1144 = vmatmul.bf16.gmra.mxu2 %v2669_v19 }
 0x506   :  { %1149 = vmatmul.bf16.gmra.mxu2 %v2670_v22 }
 0x516   :  { %1154 = vmatmul.bf16.gmra.mxu2 %v2671_v27 }
 0x526   :  { %1159 = vmatmul.bf16.gmra.mxu2 %v2672_v31 }
 0x539   :  { %v1125_v32 = vpop.f32.mrf.mxu2 }
 0x541   :  { %v1127_v33 = vpop.f32.mrf.mxu2 }
 0x542   :  { %v1165_v34 = vpack.c.bf16 %v1127_v33, %v1125_v32 }
 0x544   :  { %1251 = vmatmul.bf16.vlgmr.msra.gmra.mxu3 %v1165_v34 }
 0x549   :  { %v1130_v35 = vpop.f32.mrf.mxu2 }
 0x551   :  { %v1132_v37 = vpop.f32.mrf.mxu2 }
 0x552   :  { %v1166_v38 = vpack.c.bf16 %v1132_v37, %v1130_v35 }
 0x554   :  { %1256 = vmatmul.bf16.gmra.mxu3 %v1166_v38 }
 0x559   :  { %v1135_v40 = vpop.f32.mrf.mxu2 }
 0x561   :  { %v1137_v41 = vpop.f32.mrf.mxu2 }
 0x562   :  { %v1167_v39 = vpack.c.bf16 %v1137_v41, %v1135_v40 }
 0x564   :  { %1261 = vmatmul.bf16.gmra.mxu3 %v1167_v39 }
 0x569   :  { %v1140_v42 = vpop.f32.mrf.mxu2 }
 0x571   :  { %v1142_v43 = vpop.f32.mrf.mxu2 }
 0x572   :  { %v1168_v45 = vpack.c.bf16 %v1142_v43, %v1140_v42 }
 0x574   :  { %1266 = vmatmul.bf16.gmra.mxu3 %v1168_v45 }
 0x579   :  { %v1145_v46 = vpop.f32.mrf.mxu2 }
 0x581   :  { %v1147_v58 = vpop.f32.mrf.mxu2 }
 0x582   :  { %v1169_v48 = vpack.c.bf16 %v1147_v58, %v1145_v46 }
 0x584   :  { %1271 = vmatmul.bf16.gmra.mxu3 %v1169_v48 }
 0x589   :  { %v1150_v50 = vpop.f32.mrf.mxu2 }
 0x591   :  { %v1152_v51 = vpop.f32.mrf.mxu2 }
 0x592   :  { %v1170_v52 = vpack.c.bf16 %v1152_v51, %v1150_v50 }
 0x594   :  { %1276 = vmatmul.bf16.gmra.mxu3 %v1170_v52 }
 0x599   :  { %v1155_v56 = vpop.f32.mrf.mxu2 }
 0x5a1   :  { %v1157_v62 = vpop.f32.mrf.mxu2 }
 0x5a2   :  { %v1171_v30 = vpack.c.bf16 %v1157_v62, %v1155_v56 }
 0x5a4   :  { %1281 = vmatmul.bf16.gmra.mxu3 %v1171_v30 }
 0x5a9   :  { %v1160_v63 = vpop.f32.mrf.mxu2 }
 0x5b1   :  { %v1162_v1 = vpop.f32.mrf.mxu2 }
 0x5b2   :  { %v1172_v3 = vpack.c.bf16 %v1162_v1, %v1160_v63 }
 0x5b4   :  { %1286 = vmatmul.bf16.gmra.mxu3 %v1172_v3 }
 0x5c7   :  { %v1252_v47 = vpop.f32.mrf.mxu3 }
 0x5c8   :  { %v1253_v5 = vadd.f32 %v2661_v4, %v1252_v47 }
 0x5ca   :  { %v1292_v59 = vmax.f32 %v1253_v5, 0.0 }
 0x5cf   :  { %v1254_v57 = vpop.f32.mrf.mxu3 }
 0x5d0   :  { %v1255_v25 = vadd.f32 %v2661_v4, %v1254_v57 }
 0x5d2   :  { %v1293_v6 = vmax.f32 %v1255_v25, 0.0 }
 0x5d4   :  { %v1308_v36 = vpack.c.bf16 %v1293_v6, %v1292_v59 }
 0x5d6   :  { %1394 = vmatmul.bf16.vlgmr.msra.gmra.mxu0 %v1308_v36 }
 0x5d7   :  { %v1257_v8 = vpop.f32.mrf.mxu3 }
 0x5d8   :  { %v1258_v44 = vadd.f32 %v2661_v4, %v1257_v8 }
 0x5da   :  { %v1294_v10 = vmax.f32 %v1258_v44, 0.0 }
 0x5df   :  { %v1259_v7 = vpop.f32.mrf.mxu3 }
 0x5e0   :  { %v1260_v9 = vadd.f32 %v2661_v4, %v1259_v7 }
 0x5e2   :  { %v1295_v17 = vmax.f32 %v1260_v9, 0.0 }
 0x5e4   :  { %v1309_v20 = vpack.c.bf16 %v1295_v17, %v1294_v10 }
 0x5e6   :  { %1399 = vmatmul.bf16.gmra.mxu0 %v1309_v20 }
 0x5e7   :  { %v1262_v11 = vpop.f32.mrf.mxu3 }
 0x5e8   :  { %v1263_v13 = vadd.f32 %v2661_v4, %v1262_v11 }
 0x5ea   :  { %v1296_v16 = vmax.f32 %v1263_v13, 0.0 }
 0x5ef   :  { %v1264_v14 = vpop.f32.mrf.mxu3 }
 0x5f0   :  { %v1265_v15 = vadd.f32 %v2661_v4, %v1264_v14 }
 0x5f2   :  { %v1297_v19 = vmax.f32 %v1265_v15, 0.0 }
 0x5f4   :  { %v1310_v21 = vpack.c.bf16 %v1297_v19, %v1296_v16 }
 0x5f6   :  { %1404 = vmatmul.bf16.gmra.mxu0 %v1310_v21 }
 0x5f7   :  { %v1267_v22 = vpop.f32.mrf.mxu3 }
 0x5f8   :  { %v1268_v18 = vadd.f32 %v2661_v4, %v1267_v22 }
 0x5fa   :  { %v1298_v26 = vmax.f32 %v1268_v18, 0.0 }
 0x5ff   :  { %v1269_v23 = vpop.f32.mrf.mxu3 }
 0x600   :  { %v1270_v24 = vadd.f32 %v2661_v4, %v1269_v23 }
 0x602   :  { %v1299_v27 = vmax.f32 %v1270_v24, 0.0 }
 0x604   :  { %v1311_v28 = vpack.c.bf16 %v1299_v27, %v1298_v26 }
 0x606   :  { %1409 = vmatmul.bf16.gmra.mxu0 %v1311_v28 }
 0x607   :  { %v1272_v12 = vpop.f32.mrf.mxu3 }
 0x608   :  { %v1273_v29 = vadd.f32 %v2661_v4, %v1272_v12 }
 0x60a   :  { %v1300_v33 = vmax.f32 %v1273_v29, 0.0 }
 0x60f   :  { %v1274_v31 = vpop.f32.mrf.mxu3 }
 0x610   :  { %v1275_v32 = vadd.f32 %v2661_v4, %v1274_v31 }
 0x612   :  { %v1301_v34 = vmax.f32 %v1275_v32, 0.0 }
 0x614   :  { %v1312_v35 = vpack.c.bf16 %v1301_v34, %v1300_v33 }
 0x616   :  { %1414 = vmatmul.bf16.gmra.mxu0 %v1312_v35 }
 0x617   :  { %v1277_v37 = vpop.f32.mrf.mxu3 }
 0x618   :  { %v1278_v38 = vadd.f32 %v2661_v4, %v1277_v37 }
 0x61a   :  { %v1302_v39 = vmax.f32 %v1278_v38, 0.0 }
 0x61f   :  { %v1279_v40 = vpop.f32.mrf.mxu3 }
 0x620   :  { %v1280_v41 = vadd.f32 %v2661_v4, %v1279_v40 }
 0x622   :  { %v1303_v42 = vmax.f32 %v1280_v41, 0.0 }
 0x624   :  { %v1313_v43 = vpack.c.bf16 %v1303_v42, %v1302_v39 }
 0x626   :  { %1419 = vmatmul.bf16.gmra.mxu0 %v1313_v43 }
 0x627   :  { %v1282_v45 = vpop.f32.mrf.mxu3 }
 0x628   :  { %v1283_v46 = vadd.f32 %v2661_v4, %v1282_v45 }
 0x62a   :  { %v1304_v50 = vmax.f32 %v1283_v46, 0.0 }
 0x62f   :  { %v1284_v58 = vpop.f32.mrf.mxu3 }
 0x630   :  { %v1285_v48 = vadd.f32 %v2661_v4, %v1284_v58 }
 0x632   :  { %v1305_v51 = vmax.f32 %v1285_v48, 0.0 }
 0x634   :  { %v1314_v52 = vpack.c.bf16 %v1305_v51, %v1304_v50 }
 0x636   :  { %1424 = vmatmul.bf16.gmra.mxu0 %v1314_v52 }
 0x637   :  { %v1287_v53 = vpop.f32.mrf.mxu3 }
 0x638   :  { %v1288_v55 = vadd.f32 %v2661_v4, %v1287_v53 }
 0x63a   :  { %v1306_v61 = vmax.f32 %v1288_v55, 0.0 }
 0x63f   :  { %v1289_v56 = vpop.f32.mrf.mxu3 }
 0x640   :  { %v1290_v60 = vadd.f32 %v2661_v4, %v1289_v56 }
 0x642   :  { %v1307_v62 = vmax.f32 %v1290_v60, 0.0 }
 0x644   :  { %v1315_v30 = vpack.c.bf16 %v1307_v62, %v1306_v61 }
 0x646   :  { %1429 = vmatmul.bf16.gmra.mxu0 %v1315_v30 }
 0x653   :  { %v1395_v63 = vpop.f32.mrf.mxu0 }
 0x654   :  { %v1396_v0 = vadd.f32 %v3122_v54, %v1395_v63 }
 0x656   :  { %v1435_v49 = vmax.f32 %v1396_v0, 0.0  ;;  %v3140_v0 = vld [vmem:[#allocation8] sm:$0x1] }
 0x657   :  { %1665 = vmatmul.bf16.vlgmr.msrb.gmra.mxu2 %v3140_v0  ;;  %1652 = vmatmul.bf16.vlgmr.msra.gmra.mxu1 %v3140_v0 }
 0x658   :  { %v1451_v1 = vpack.c.bf16 %v1435_v49, %v1435_v49 }
 0x65a   :  { %1467 = vst [vmem:[#allocation2 + $0x8] sm:$0xf] %v1451_v1 }
 0x65b   :  { %v1397_v2 = vpop.f32.mrf.mxu0 }
 0x65c   :  { %v1398_v3 = vadd.f32 %v3122_v54, %v1397_v2 }
 0x65e   :  { %v1436_v47 = vmax.f32 %v1398_v3, 0.0 }
 0x660   :  { %v1452_v5 = vpack.c.bf16 %v1436_v47, %v1436_v47  ;;  %v2611_v47 = vld [vmem:[#allocation14 + $0x78] sm:$0xff] }
 0x661   :  { %1895 = vmatpush.bf16.msra.mxu2 %v2611_v47  ;;  %v2620_v47 = vld [vmem:[#allocation15] sm:$0xff] }
 0x662   :  { %1468 = vst [vmem:[#allocation2 + $0x14] sm:$0xf] %v1452_v5  ;;  %v2603_v5 = vld [vmem:[#allocation14 + $0x38] sm:$0xff] }
 0x663   :  { %v1400_v57 = vpop.f32.mrf.mxu0  ;;  %1882 = vmatpush.bf16.msrb.mxu1 %v2603_v5  ;;  %v2663_v5 = vld [vmem:[%s3162_s8] ss:$0 sm:$0xff] }
 0x664   :  { %v1401_v4 = vadd.f32 %v3122_v54, %v1400_v57 }
 0x666   :  { %v1437_v25 = vmax.f32 %v1401_v4, 0.0  ;;  %v2602_v4 = vld [vmem:[#allocation14 + $0x30] sm:$0xff] }
 0x667   :  { %1883 = vmatpush.bf16.msrb.mxu1 %v2602_v4 }
 0x668   :  { %v1453_v59 = vpack.c.bf16 %v1437_v25, %v1437_v25 }
 0x66a   :  { %1469 = vst [vmem:[#allocation2 + $0x20] sm:$0xf] %v1453_v59 }
 0x66b   :  { %v1402_v6 = vpop.f32.mrf.mxu0 }
 0x66c   :  { %v1403_v36 = vadd.f32 %v3122_v54, %v1402_v6 }
 0x66e   :  { %v1438_v8 = vmax.f32 %v1403_v36, 0.0  ;;  %v2609_v36 = vld [vmem:[#allocation14 + $0x68] sm:$0xff] }
 0x670   :  { %v1454_v44 = vpack.c.bf16 %v1438_v8, %v1438_v8  ;;  %v2601_v8 = vld [vmem:[#allocation14 + $0x28] sm:$0xff] }
 0x671   :  { %1884 = vmatpush.bf16.msrb.mxu1 %v2601_v8  ;;  %v2664_v8 = vld [vmem:[%s3164_s10] ss:$0 sm:$0xff] }
 0x672   :  { %1470 = vst [vmem:[#allocation2 + $0x2c] sm:$0xf] %v1454_v44 }
 0x673   :  { %v1405_v7 = vpop.f32.mrf.mxu0 }
 0x674   :  { %v1406_v9 = vadd.f32 %v3122_v54, %v1405_v7 }
 0x676   :  { %v1439_v10 = vmax.f32 %v1406_v9, 0.0 }
 0x678   :  { %v1455_v17 = vpack.c.bf16 %v1439_v10, %v1439_v10  ;;  %v2608_v10 = vld [vmem:[#allocation14 + $0x60] sm:$0xff] }
 0x67a   :  { %1471 = vst [vmem:[#allocation2 + $0x38] sm:$0xf] %v1455_v17  ;;  %v2600_v17 = vld [vmem:[#allocation14 + $0x20] sm:$0xff] }
 0x67b   :  { %v1407_v20 = vpop.f32.mrf.mxu0  ;;  %1885 = vmatpush.bf16.msrb.mxu1 %v2600_v17 }
 0x67c   :  { %v1408_v11 = vadd.f32 %v3122_v54, %v1407_v20 }
 0x67e   :  { %v1440_v13 = vmax.f32 %v1408_v11, 0.0 }
 0x680   :  { %v1456_v14 = vpack.c.bf16 %v1440_v13, %v1440_v13 }
 0x682   :  { %1472 = vst [vmem:[#allocation2 + $0x44] sm:$0xf] %v1456_v14  ;;  %v2607_v14 = vld [vmem:[#allocation14 + $0x58] sm:$0xff] }
 0x683   :  { %v1410_v15 = vpop.f32.mrf.mxu0 }
 0x684   :  { %v1411_v16 = vadd.f32 %v3122_v54, %v1410_v15  ;;  %v2599_v15 = vld [vmem:[#allocation14 + $0x18] sm:$0xff] }
 0x685   :  { %1886 = vmatpush.bf16.msrb.mxu1 %v2599_v15 }
 0x686   :  { %v1441_v19 = vmax.f32 %v1411_v16, 0.0 }
 0x688   :  { %v1457_v21 = vpack.c.bf16 %v1441_v19, %v1441_v19 }
 0x689   :  { %v2580_v19 = vld [vmem:[#allocation2 + $0x40] sm:$0xf0] }
 0x68a   :  { %1473 = vst [vmem:[#allocation2 + $0x50] sm:$0xf] %v1457_v21  ;;  %v2318_v21 = vld [vmem:[#allocation2 + $0x38] sm:$0xf] }
 0x68b   :  { %v1412_v22 = vpop.f32.mrf.mxu0 }
 0x68c   :  { %v1413_v18 = vadd.f32 %v3122_v54, %v1412_v22  ;;  %v2606_v22 = vld [vmem:[#allocation14 + $0x50] sm:$0xff] }
 0x68e   :  { %v1442_v23 = vmax.f32 %v1413_v18, 0.0  ;;  %v2598_v18 = vld [vmem:[#allocation14 + $0x10] sm:$0xff] }
 0x68f   :  { %1887 = vmatpush.bf16.msrb.mxu1 %v2598_v18 }
 0x690   :  { %v1458_v24 = vpack.c.bf16 %v1442_v23, %v1442_v23  ;;  %v2319_v23 = vor.u32 %v2580_v19, %v2318_v21 }
 0x691   :  { %v2330_v13 = vld [vmem:[#allocation2 + $0x50] sm:$0xf] }
 0x692   :  { %1474 = vst [vmem:[#allocation2 + $0x5c] sm:$0xf] %v1458_v24  ;;  %v2577_v24 = vld [vmem:[#allocation2 + $0x28] sm:$0xf0] }
 0x693   :  { %v1415_v26 = vpop.f32.mrf.mxu0 }
 0x694   :  { %v1416_v27 = vadd.f32 %v3122_v54, %v1415_v26  ;;  %v2306_v26 = vld [vmem:[#allocation2 + $0x20] sm:$0xf] }
 0x696   :  { %v1443_v28 = vmax.f32 %v1416_v27, 0.0  ;;  %v2605_v27 = vld [vmem:[#allocation14 + $0x48] sm:$0xff] }
 0x698   :  { %v1459_v12 = vpack.c.bf16 %v1443_v28, %v1443_v28  ;;  %v2307_v28 = vor.u32 %v2577_v24, %v2306_v26 }
 0x699   :  { %v2583_v11 = vld [vmem:[#allocation2 + $0x58] sm:$0xf0] }
 0x69a   :  { %1475 = vst [vmem:[#allocation2 + $0x68] sm:$0xf] %v1459_v12  ;;  %v2331_v16 = vor.u32 %v2583_v11, %v2330_v13  ;;  %v2574_v12 = vld [vmem:[#allocation2 + $0x10] sm:$0xf0] }
 0x69b   :  { %v1417_v29 = vpop.f32.mrf.mxu0 }
 0x69c   :  { %v1418_v31 = vadd.f32 %v3122_v54, %v1417_v29  ;;  %v2294_v29 = vld [vmem:[#allocation2 + $0x8] sm:$0xf] }
 0x69e   :  { %v1444_v32 = vmax.f32 %v1418_v31, 0.0  ;;  %v2619_v31 = vld [vmem:[#allocation14 + $0xb8] sm:$0xff] }
 0x6a0   :  { %v1460_v33 = vpack.c.bf16 %v1444_v32, %v1444_v32  ;;  %v2295_v32 = vor.u32 %v2574_v12, %v2294_v29 }
 0x6a1   :  { %v2342_v9 = vld [vmem:[#allocation2 + $0x68] sm:$0xf] }
 0x6a2   :  { %1476 = vst [vmem:[#allocation2 + $0x74] sm:$0xf] %v1460_v33  ;;  %v2618_v33 = vld [vmem:[#allocation14 + $0xb0] sm:$0xff] }
 0x6a3   :  { %v1420_v34 = vpop.f32.mrf.mxu0 }
 0x6a4   :  { %v1421_v35 = vadd.f32 %v3122_v54, %v1420_v34  ;;  %v2617_v34 = vld [vmem:[#allocation14 + $0xa8] sm:$0xff] }
 0x6a6   :  { %v1445_v37 = vmax.f32 %v1421_v35, 0.0  ;;  %v2616_v35 = vld [vmem:[#allocation14 + $0xa0] sm:$0xff] }
 0x6a8   :  { %v1461_v38 = vpack.c.bf16 %v1445_v37, %v1445_v37  ;;  %v2615_v37 = vld [vmem:[#allocation14 + $0x98] sm:$0xff] }
 0x6a9   :  { %v2586_v7 = vld [vmem:[#allocation2 + $0x70] sm:$0xf0] }
 0x6aa   :  { %1477 = vst [vmem:[#allocation2 + $0x80] sm:$0xf] %v1461_v38  ;;  %v2343_v20 = vor.u32 %v2586_v7, %v2342_v9  ;;  %v2614_v38 = vld [vmem:[#allocation14 + $0x90] sm:$0xff] }
 0x6ab   :  { %v1422_v40 = vpop.f32.mrf.mxu0 }
 0x6ac   :  { %v1423_v41 = vadd.f32 %v3122_v54, %v1422_v40  ;;  %v2613_v40 = vld [vmem:[#allocation14 + $0x88] sm:$0xff] }
 0x6ae   :  { %v1446_v39 = vmax.f32 %v1423_v41, 0.0  ;;  %v2597_v41 = vld [vmem:[#allocation14 + $0x8] sm:$0xff] }
 0x6af   :  { %1888 = vmatpush.bf16.msrb.mxu1 %v2597_v41 }
 0x6b0   :  { %v1462_v42 = vpack.c.bf16 %v1446_v39, %v1446_v39  ;;  %v2604_v39 = vld [vmem:[#allocation14 + $0x40] sm:$0xff] }
 0x6b1   :  { %v2354_v6 = vld [vmem:[#allocation2 + $0x80] sm:$0xf] }
 0x6b2   :  { %1478 = vst [vmem:[#allocation2 + $0x8c] sm:$0xf] %v1462_v42 }
 0x6b3   :  { %v1425_v43 = vpop.f32.mrf.mxu0 }
 0x6b4   :  { %v1426_v45 = vadd.f32 %v3122_v54, %v1425_v43 }
 0x6b6   :  { %v1447_v46 = vmax.f32 %v1426_v45, 0.0  ;;  %v2596_v45 = vld [vmem:[#allocation14] sm:$0xff] }
 0x6b7   :  { %1889 = vmatpush.bf16.msrb.mxu1 %v2596_v45 }
 0x6b8   :  { %v1463_v58 = vpack.c.bf16 %v1447_v46, %v1447_v46 }
 0x6b9   :  { %v2589_v59 = vld [vmem:[#allocation2 + $0x88] sm:$0xf0] }
 0x6ba   :  { %1479 = vst [vmem:[#allocation2 + $0x98] sm:$0xf] %v1463_v58  ;;  %v2355_v44 = vor.u32 %v2589_v59, %v2354_v6 }
 0x6bb   :  { %v1427_v48 = vpop.f32.mrf.mxu0 }
 0x6bc   :  { %v1428_v50 = vadd.f32 %v3122_v54, %v1427_v48  ;;  %v2612_v48 = vld [vmem:[#allocation14 + $0x80] sm:$0xff] }
 0x6be   :  { %v1448_v51 = vmax.f32 %v1428_v50, 0.0 }
 0x6c0   :  { %v1464_v52 = vpack.c.bf16 %v1448_v51, %v1448_v51 }
 0x6c1   :  { %v2366_v57 = vld [vmem:[#allocation2 + $0x98] sm:$0xf] }
 0x6c2   :  { %1480 = vst [vmem:[#allocation2 + $0xa4] sm:$0xf] %v1464_v52  ;;  %v2627_v52 = vld [vmem:[#allocation15 + $0x38] sm:$0xff] }
 0x6c3   :  { %v1430_v53 = vpop.f32.mrf.mxu0  ;;  %1991 = vmatpush.bf16.msra.mxu1 %v2627_v52 }
 0x6c4   :  { %v1431_v55 = vadd.f32 %v3122_v54, %v1430_v53  ;;  %v2626_v53 = vld [vmem:[#allocation15 + $0x30] sm:$0xff] }
 0x6c6   :  { %v1449_v56 = vmax.f32 %v1431_v55, 0.0  ;;  %v2625_v55 = vld [vmem:[#allocation15 + $0x28] sm:$0xff] }
 0x6c7   :  { %1992 = vmatpush.bf16.msra.mxu1 %v2626_v53 }
 0x6c8   :  { %v1465_v60 = vpack.c.bf16 %v1449_v56, %v1449_v56  ;;  %v2624_v56 = vld [vmem:[#allocation15 + $0x20] sm:$0xff] }
 0x6c9   :  { %v2592_v3 = vld [vmem:[#allocation2 + $0xa0] sm:$0xf0] }
 0x6ca   :  { %1481 = vst [vmem:[#allocation2 + $0xb0] sm:$0xf] %v1465_v60  ;;  %v2367_v25 = vor.u32 %v2592_v3, %v2366_v57  ;;  %v2623_v60 = vld [vmem:[#allocation15 + $0x18] sm:$0xff] }
 0x6cb   :  { %v1432_v61 = vpop.f32.mrf.mxu0  ;;  %1993 = vmatpush.bf16.msra.mxu1 %v2625_v55 }
 0x6cc   :  { %v1433_v62 = vadd.f32 %v3122_v54, %v1432_v61  ;;  %v2610_v54 = vld [vmem:[#allocation14 + $0x70] sm:$0xff] }
 0x6cd   :  { %1896 = vmatpush.bf16.msra.mxu2 %v2610_v54 }
 0x6ce   :  { %v1450_v30 = vmax.f32 %v1433_v62, 0.0 }
 0x6cf   :  { %1994 = vmatpush.bf16.msra.mxu1 %v2624_v56 }
 0x6d0   :  { %v1466_v63 = vpack.c.bf16 %v1450_v30, %v1450_v30 }
 0x6d1   :  { %v2378_v49 = vld [vmem:[#allocation2 + $0xb0] sm:$0xf]  ;;  %1897 = vmatpush.bf16.msra.mxu2 %v2609_v36 }
 0x6d2   :  { %1482 = vst [vmem:[#allocation2 + $0xbc] sm:$0xf] %v1466_v63  ;;  %v2622_v63 = vld [vmem:[#allocation15 + $0x10] sm:$0xff] }
 0x6d3   :  { %1995 = vmatpush.bf16.msra.mxu1 %v2623_v60 }
 0x6d4   :  { %v1653_v46 = vpop.f32.mrf.mxu1 }
 0x6d5   :  { %1898 = vmatpush.bf16.msra.mxu2 %v2608_v10  ;;  %v1683_v58 = vpack.c.bf16 %v1653_v46, %v1653_v46 }
 0x6d7   :  { %1890 = vmatmul.bf16.vlgmr.msrb.gmra.mxu1 %v1683_v58 }
 0x6d8   :  { %1996 = vmatpush.bf16.msra.mxu1 %v2622_v63 }
 0x6d9   :  { %v2595_v1 = vld [vmem:[#allocation2 + $0xb8] sm:$0xf0]  ;;  %1899 = vmatpush.bf16.msra.mxu2 %v2607_v14 }
 0x6da   :  { %v2379_v2 = vor.u32 %v2595_v1, %v2378_v49  ;;  %v1666_v42 = vpop.f32.mrf.mxu2 }
 0x6db   :  { %v1684_v43 = vpack.c.bf16 %v1666_v42, %v1666_v42 }
 0x6dc   :  { %1670 = vmatpush.bf16.msrb.mxu3 %v2379_v2  ;;  %v1655_v51 = vpop.f32.mrf.mxu1  ;;  %v2621_v2 = vld [vmem:[#allocation15 + $0x8] sm:$0xff] }
 0x6dd   :  { %1900 = vmatpush.bf16.msra.mxu2 %v2606_v22  ;;  %1997 = vmatpush.bf16.msra.mxu1 %v2621_v2 }
 0x6e0   :  { %1671 = vmatpush.bf16.msrb.mxu3 %v2367_v25 }
 0x6e1   :  { %1901 = vmatpush.bf16.msra.mxu2 %v2605_v27  ;;  %1998 = vmatpush.bf16.msra.mxu1 %v2620_v47 }
 0x6e2   :  { %v1668_v50 = vpop.f32.mrf.mxu2 }
 0x6e4   :  { %1672 = vmatpush.bf16.msrb.mxu3 %v2355_v44 }
 0x6e5   :  { %1902 = vmatpush.bf16.msra.mxu2 %v2604_v39 }
 0x6e8   :  { %1673 = vmatpush.bf16.msrb.mxu3 %v2343_v20  ;;  %1903 = vmatmul.bf16.vlgmr.msra.gmra.mxu2 %v1684_v43 }
 0x6ec   :  { %1674 = vmatpush.bf16.msrb.mxu3 %v2331_v16 }
 0x6f0   :  { %1675 = vmatpush.bf16.msrb.mxu3 %v2319_v23 }
 0x6f4   :  { %1676 = vmatpush.bf16.msrb.mxu3 %v2307_v28 }
 0x6f8   :  { %1677 = vmatpush.bf16.msrb.mxu3 %v2295_v32 }
 0x6fb   :  { %1678 = vmatmul.bf16.vlgmr.msrb.gmra.mxu3 %v3140_v0 }
 0x6fc   :  { %1908 = vmatpush.bf16.msra.mxu3 %v2619_v31 }
 0x700   :  { %1909 = vmatpush.bf16.msra.mxu3 %v2618_v33 }
 0x704   :  { %1910 = vmatpush.bf16.msra.mxu3 %v2617_v34 }
 0x708   :  { %1911 = vmatpush.bf16.msra.mxu3 %v2616_v35 }
 0x70c   :  { %1912 = vmatpush.bf16.msra.mxu3 %v2615_v37 }
 0x710   :  { %1913 = vmatpush.bf16.msra.mxu3 %v2614_v38 }
 0x714   :  { %1914 = vmatpush.bf16.msra.mxu3 %v2613_v40 }
 0x718   :  { %1915 = vmatpush.bf16.msra.mxu3 %v2612_v48 }
 0x754   :  { %v1891_v0 = vpop.f32.mrf.mxu1 }
 0x755   :  { %v1892_v57 = vadd.f32 %v2663_v5, %v1891_v0 }
 0x75c   :  { %v1893_v1 = vpop.f32.mrf.mxu1 }
 0x76b   :  { %v1904_v49 = vpop.f32.mrf.mxu2 }
 0x76c   :  { %v1905_v54 = vadd.f32 %v1904_v49, %v1892_v57 }
 0x773   :  { %v1906_v3 = vpop.f32.mrf.mxu2 }
 0x77e   :  { %v1679_v61 = vpop.f32.mrf.mxu3 }
 0x77f   :  { %v1685_v62 = vpack.c.bf16 %v1679_v61, %v1679_v61 }
 0x781   :  { %1916 = vmatmul.bf16.vlgmr.msra.gmra.mxu3 %v1685_v62 }
 0x786   :  { %v1681_v30 = vpop.f32.mrf.mxu3 }
 0x804   :  { %v1917_v4 = vpop.f32.mrf.mxu3 }
 0x805   :  { %v1918_v25 = vadd.f32 %v1917_v4, %v1905_v54 }
 0x807   :  { %v1921_v59 = vmax.f32 %v1918_v25, 0.0 }
 0x809   :  { %v1922_v6 = vpack.c.bf16 %v1921_v59, %v1921_v59 }
 0x80b   :  { %1999 = vmatmul.bf16.vlgmr.msra.gmra.mxu1 %v1922_v6 }
 0x80c   :  { %v1919_v36 = vpop.f32.mrf.mxu3 }
 0x888   :  { %v2000_v44 = vpop.f32.mrf.mxu1 }
 0x889   :  { %v2001_v7 = vadd.f32 %v2664_v8, %v2000_v44 }
 0x88b   :  { %2004 = vst [vmem:[#allocation17] sm:$0x3] %v2001_v7 }
 0x88c   :  { %2015 = dma.vmem_to_hbm [thread:$0]  %s2011_s22, 32, %s2013_s24, [#allocation5]  }
 0x890   :  { %v2002_v9 = vpop.f32.mrf.mxu1 }
 0x891   :  { %2899 = dma.done.wait [#allocation5], 32  }
 0x892   :  { %2900 = vsyncadd [#allocation5], 4294967264 }
 0x893   :  { %2020 = vsyncpa [#allocation4], 1 }
 0x894   :  { %2021 = vsyncpa [#allocation7], 1 }
 0x895   :  { %2022 = vsyncpa [#allocation10], 1 }
 0x896   :  { %2023 = vsyncpa [#allocation13], 1 }
 0x897   :  { %2024 = vsyncpa [#allocation16], 1 }
 0x898   :  { %2025 = vsyncpa [#allocation5], 1 }

</bundles_post_ra>
